<compile_context>
chip_gen: v6e
topology: v6e:2x2x1
jax: 0.10.0
libtpu: 0.0.40
codegen_flags: <defaults>
</compile_context>

<pallas_src>
import functools

import jax
import jax.numpy as jnp
from jax import lax
from jax.experimental import pallas as pl
from jax.experimental.pallas import tpu as pltpu


def _neg_softplus(a):
    # -softplus(a) = log(sigmoid(-a)), numerically stable; shared by kernel
    # and reference so the correctness check compares identical math.
    return -(jnp.maximum(a, 0.0) + jnp.log(1.0 + jnp.exp(-jnp.abs(a))))


def _device_kind():
    try:
        return jax.devices()[0].device_kind.lower()
    except Exception:
        return ""


def _supports_bf16_vector_math():
    # v6e and later have bf16 VPU/EUP paths; v5e and earlier do not, so keep
    # all elementwise/transcendental math f32 there (per review).
    kind = _device_kind()
    return not any(tag in kind for tag in ("v2", "v3", "v4", "v5"))


def _default_batch_tile(batch):
    # Review: grid=1 on single-TC chips (v5e/v6e); grid=2 on v7x so the
    # "parallel" grid axis shards one step per TensorCore.
    if "v7" in _device_kind() and batch % 2 == 0:
        return batch // 2
    return batch


def _discriminator_kernel(x_ref, we_ref, be_ref, wab_ref, bab_ref,
                          wd_ref, bd_ref, out_ref, *, act_dtype):
    # encoder(x).detach(): Linear + tanh.  bf16 MXU operands, f32 accumulation.
    x = x_ref[...].astype(jnp.bfloat16)                              # [TM, D_IN]
    pre_e = (jnp.dot(x, we_ref[...], preferred_element_type=jnp.float32)
             + be_ref[...])                                          # [TM, H] f32
    enc = jnp.tanh(pre_e.astype(act_dtype))                          # [TM, H]

    # fake = ab(enc_out).detach(): Linear + tanh.
    pre_ab = (jnp.dot(enc.astype(jnp.bfloat16), wab_ref[...],
                      preferred_element_type=jnp.float32)
              + bab_ref[...])                                        # [TM, H] f32
    fake = jnp.tanh(pre_ab.astype(act_dtype))                        # [TM, H]

    # fake_discriminator head, lane-dense: logits as a [1, TM] ROW via
    # wd @ act^T (contract on H, f32 accumulation), so the softplus below
    # runs on ~TM/128 full-width vregs instead of TM/8 one-lane vregs.
    wd = wd_ref[...].astype(jnp.bfloat16)                            # [1, H]
    bd = bd_ref[0]                                                   # SMEM scalar
    dn = (((1,), (1,)), ((), ()))
    z_t = lax.dot_general(wd, enc.astype(jnp.bfloat16), dn,
                          preferred_element_type=jnp.float32) + bd   # [1, TM]
    z_f = lax.dot_general(wd, fake.astype(jnp.bfloat16), dn,
                          preferred_element_type=jnp.float32) + bd   # [1, TM]

    # BCE terms via stable log-sigmoid:
    #   log(sigmoid(z))     = -softplus(-z)
    #   log(1 - sigmoid(z)) = -softplus(z)
    # Clamp at -100 kept for PyTorch-BCE parity (numerical no-op here).
    log_p_true = jnp.maximum(_neg_softplus(-z_t), -100.0)            # [1, TM]
    log_1m_fake = jnp.maximum(_neg_softplus(z_f), -100.0)            # [1, TM]

    s_t = jnp.sum(log_p_true, keepdims=True)                         # (1, 1)
    s_f = jnp.sum(log_1m_fake, keepdims=True)                        # (1, 1)

    # Lane-dense (8,128) f32 partial-sum block for this batch tile:
    #   [0,0] = sum(log p_true), [0,1] = sum(log(1-p_fake)), zeros elsewhere.
    sub = lax.broadcasted_iota(jnp.int32, (8, 128), 0)
    lane = lax.broadcasted_iota(jnp.int32, (8, 128), 1)
    out_ref[...] = jnp.where((sub == 0) & (lane == 0), s_t,
                             jnp.where((sub == 0) & (lane == 1), s_f, 0.0))


def discriminator_forward(x, params, *, tm=None):
    """Returns (true_loss, fake_loss), each shape (1,) f32 — matching
    `loss.unsqueeze(0)` from the PyTorch forward."""
    we, be, wab, bab, wd, bd = params
    B, d_in = x.shape
    H = we.shape[1]
    if tm is None:
        tm = _default_batch_tile(B)
    assert B % tm == 0, "batch must be a multiple of the batch tile"
    g = B // tm

    act_dtype = jnp.bfloat16 if _supports_bf16_vector_math() else jnp.float32
    kernel = functools.partial(_discriminator_kernel, act_dtype=act_dtype)

    partial = pl.pallas_call(
        kernel,
        out_shape=jax.ShapeDtypeStruct((g * 8, 128), jnp.float32),
        grid_spec=pltpu.PrefetchScalarGridSpec(
            num_scalar_prefetch=0,
            grid=(g,),
            in_specs=[
                pl.BlockSpec((tm, d_in), lambda i: (i, 0)),   # x: batch-tiled
                pl.BlockSpec((d_in, H), lambda i: (0, 0)),    # we  (resident)
                pl.BlockSpec((1, H), lambda i: (0, 0)),       # be  (resident)
                pl.BlockSpec((H, H), lambda i: (0, 0)),       # wab (resident)
                pl.BlockSpec((1, H), lambda i: (0, 0)),       # bab (resident)
                pl.BlockSpec((1, H), lambda i: (0, 0)),       # wd row (resident)
                pl.BlockSpec(memory_space=pltpu.MemorySpace.SMEM),  # bd scalar
            ],
            out_specs=pl.BlockSpec((8, 128), lambda i: (i, 0)),
        ),
        compiler_params=pltpu.CompilerParams(
            dimension_semantics=("parallel",)),    # 1 step/TC on v7x
    )(x, we, be, wab, bab, wd, bd)

    # Finalize: tiny XLA reduce of the per-tile partial sums, then -mean.
    sums = jnp.sum(partial, axis=0)                # (128,), lanes 0/1 used
    true_loss = (-sums[0] / B).reshape(1)
    fake_loss = (-sums[1] / B).reshape(1)
    return true_loss, fake_loss


def init_params(key, d_in, hidden):
    """Xavier-uniform-style init; MXU weights stored in bf16, rest f32."""
    k1, k2, k3 = jax.random.split(key, 3)

    def xavier(k, fan_in, fan_out, dtype):
        bound = (6.0 / (fan_in + fan_out)) ** 0.5
        return jax.random.uniform(k, (fan_in, fan_out), jnp.float32,
                                  -bound, bound).astype(dtype)

    we = xavier(k1, d_in, hidden, jnp.bfloat16)      # encoder weight (MXU)
    be = jnp.zeros((1, hidden), jnp.float32)
    wab = xavier(k2, hidden, hidden, jnp.bfloat16)   # ab translator weight (MXU)
    bab = jnp.zeros((1, hidden), jnp.float32)
    wd = xavier(k3, hidden, 1, jnp.float32).reshape(1, hidden)  # head row
    bd = jnp.zeros((1,), jnp.float32)                # head bias (SMEM scalar)
    return we, be, wab, bab, wd, bd


if __name__ == "__main__":
    # Lane-aligned feature dims; batch tile chosen per chip (grid=1 or 2).
    B, D_IN, HIDDEN = 1024, 128, 128

    key = jax.random.PRNGKey(0)
    kx, kt, kp = jax.random.split(key, 3)

    x = jax.random.normal(kx, (B, D_IN), jnp.float32)
    # `tgt` is accepted by the PyTorch forward but never used; kept for parity.
    tgt = jax.random.normal(kt, (B, D_IN), jnp.float32)  # unused, as in torch
    params = init_params(kp, D_IN, HIDDEN)

    true_loss, fake_loss = discriminator_forward(x, params)
    jax.block_until_ready((true_loss, fake_loss))

    # Pure-JAX reference with identical dtype/math choices.
    bf16_act = _supports_bf16_vector_math()
    act_dtype = jnp.bfloat16 if bf16_act else jnp.float32
    we, be, wab, bab, wd, bd = params
    pre_e = jnp.dot(x.astype(jnp.bfloat16), we,
                    preferred_element_type=jnp.float32) + be
    enc = jnp.tanh(pre_e.astype(act_dtype))
    pre_ab = jnp.dot(enc.astype(jnp.bfloat16), wab,
                     preferred_element_type=jnp.float32) + bab
    fake = jnp.tanh(pre_ab.astype(act_dtype))
    wd_b = wd.astype(jnp.bfloat16)
    z_t = jnp.dot(enc.astype(jnp.bfloat16), wd_b.T,
                  preferred_element_type=jnp.float32) + bd           # [B, 1]
    z_f = jnp.dot(fake.astype(jnp.bfloat16), wd_b.T,
                  preferred_element_type=jnp.float32) + bd           # [B, 1]
    ref_t = -jnp.mean(jnp.maximum(_neg_softplus(-z_t), -100.0))
    ref_f = -jnp.mean(jnp.maximum(_neg_softplus(z_f), -100.0))

    # bf16 tanh (v6e/v7x) may round slightly differently inside Mosaic vs XLA;
    # loosen tolerance on that path only.
    tol = 5e-3 if bf16_act else 1e-4
    assert jnp.allclose(true_loss[0], ref_t, atol=tol, rtol=tol), (true_loss, ref_t)
    assert jnp.allclose(fake_loss[0], ref_f, atol=tol, rtol=tol), (fake_loss, ref_f)

    print("KERNEL_OK")
</pallas_src>

<mosaic_0001>
module attributes {stable_mosaic.version = 11 : i64} {
  func.func @_discriminator_kernel(%arg0: i32, %arg1: memref<1024x128xf32, #tpu.memory_space<vmem>>, %arg2: memref<128x128xbf16, #tpu.memory_space<vmem>>, %arg3: memref<1x128xf32, #tpu.memory_space<vmem>>, %arg4: memref<128x128xbf16, #tpu.memory_space<vmem>>, %arg5: memref<1x128xf32, #tpu.memory_space<vmem>>, %arg6: memref<1x128xf32, #tpu.memory_space<vmem>>, %arg7: memref<1xf32, #tpu.memory_space<smem>>, %arg8: memref<8x128xf32, #tpu.memory_space<vmem>>) attributes {dimension_semantics = [#tpu.dimension_semantics<parallel>], iteration_bounds = array<i64: 1>, scalar_prefetch = 0 : i64, scratch_operands = 0 : i64, tpu.core_type = #tpu.core_type<tc>, window_params = [{transform_indices = @transform_0, window_bounds = array<i64: 1024, 128>}, {pipeline_mode = #tpu.pipeline_mode<synchronous>, transform_indices = @transform_1, window_bounds = array<i64: 128, 128>}, {pipeline_mode = #tpu.pipeline_mode<synchronous>, transform_indices = @transform_2, window_bounds = array<i64: 1, 128>}, {pipeline_mode = #tpu.pipeline_mode<synchronous>, transform_indices = @transform_3, window_bounds = array<i64: 128, 128>}, {pipeline_mode = #tpu.pipeline_mode<synchronous>, transform_indices = @transform_4, window_bounds = array<i64: 1, 128>}, {pipeline_mode = #tpu.pipeline_mode<synchronous>, transform_indices = @transform_5, window_bounds = array<i64: 1, 128>}, {transform_indices = @transform_6, window_bounds = array<i64: 1>}, {transform_indices = @transform_7, window_bounds = array<i64: 8, 128>}]} {
    %c0 = arith.constant 0 : index
    %c0_0 = arith.constant 0 : index
    %0 = vector.load %arg1[%c0, %c0_0] : memref<1024x128xf32, #tpu.memory_space<vmem>>, vector<1024x128xf32>
    %1 = arith.truncf %0 : vector<1024x128xf32> to vector<1024x128xbf16>
    %c0_1 = arith.constant 0 : index
    %c0_2 = arith.constant 0 : index
    %2 = vector.load %arg2[%c0_1, %c0_2] : memref<128x128xbf16, #tpu.memory_space<vmem>>, vector<128x128xbf16>
    %cst = arith.constant dense<0.000000e+00> : vector<1024x128xf32>
    %3 = tpu.matmul %1, %2, %cst {dimension_numbers = #tpu.dot_dimension_numbers<[1], [0], [0], [1], [0, 0, 1, 1], [], []>} : vector<1024x128xbf16>, vector<128x128xbf16>, vector<1024x128xf32> -> vector<1024x128xf32>
    %c0_3 = arith.constant 0 : index
    %c0_4 = arith.constant 0 : index
    %4 = vector.load %arg3[%c0_3, %c0_4] : memref<1x128xf32, #tpu.memory_space<vmem>>, vector<1x128xf32>
    %5 = vector.broadcast %4 : vector<1x128xf32> to vector<1024x128xf32>
    %6 = arith.addf %3, %5 : vector<1024x128xf32>
    %7 = arith.truncf %6 : vector<1024x128xf32> to vector<1024x128xbf16>
    %8 = math.tanh %7 : vector<1024x128xbf16>
    %c0_5 = arith.constant 0 : index
    %c0_6 = arith.constant 0 : index
    %9 = vector.load %arg4[%c0_5, %c0_6] : memref<128x128xbf16, #tpu.memory_space<vmem>>, vector<128x128xbf16>
    %cst_7 = arith.constant dense<0.000000e+00> : vector<1024x128xf32>
    %10 = tpu.matmul %8, %9, %cst_7 {dimension_numbers = #tpu.dot_dimension_numbers<[1], [0], [0], [1], [0, 0, 1, 1], [], []>} : vector<1024x128xbf16>, vector<128x128xbf16>, vector<1024x128xf32> -> vector<1024x128xf32>
    %c0_8 = arith.constant 0 : index
    %c0_9 = arith.constant 0 : index
    %11 = vector.load %arg5[%c0_8, %c0_9] : memref<1x128xf32, #tpu.memory_space<vmem>>, vector<1x128xf32>
    %12 = vector.broadcast %11 : vector<1x128xf32> to vector<1024x128xf32>
    %13 = arith.addf %10, %12 : vector<1024x128xf32>
    %14 = arith.truncf %13 : vector<1024x128xf32> to vector<1024x128xbf16>
    %15 = math.tanh %14 : vector<1024x128xbf16>
    %c0_10 = arith.constant 0 : index
    %c0_11 = arith.constant 0 : index
    %16 = vector.load %arg6[%c0_10, %c0_11] : memref<1x128xf32, #tpu.memory_space<vmem>>, vector<1x128xf32>
    %17 = arith.truncf %16 : vector<1x128xf32> to vector<1x128xbf16>
    %c0_12 = arith.constant 0 : index
    %18 = memref.load %arg7[%c0_12] : memref<1xf32, #tpu.memory_space<smem>>
    %cst_13 = arith.constant dense<0.000000e+00> : vector<1x1024xf32>
    %19 = tpu.matmul %17, %8, %cst_13 {dimension_numbers = #tpu.dot_dimension_numbers<[1], [1], [0], [0], [0, 0, 1, 0], [], []>} : vector<1x128xbf16>, vector<1024x128xbf16>, vector<1x1024xf32> -> vector<1x1024xf32>
    %20 = vector.broadcast %18 : f32 to vector<1x1024xf32>
    %21 = arith.addf %19, %20 : vector<1x1024xf32>
    %cst_14 = arith.constant dense<0.000000e+00> : vector<1x1024xf32>
    %22 = tpu.matmul %17, %15, %cst_14 {dimension_numbers = #tpu.dot_dimension_numbers<[1], [1], [0], [0], [0, 0, 1, 0], [], []>} : vector<1x128xbf16>, vector<1024x128xbf16>, vector<1x1024xf32> -> vector<1x1024xf32>
    %23 = vector.broadcast %18 : f32 to vector<1x1024xf32>
    %24 = arith.addf %22, %23 : vector<1x1024xf32>
    %cst_15 = arith.constant 0.000000e+00 : f32
    %25 = vector.broadcast %cst_15 : f32 to vector<1x1024xf32>
    %26 = arith.subf %25, %21 : vector<1x1024xf32>
    %cst_16 = arith.constant 0.000000e+00 : f32
    %27 = vector.broadcast %cst_16 : f32 to vector<1x1024xf32>
    %28 = arith.maximumf %26, %27 : vector<1x1024xf32>
    %29 = math.absf %26 : vector<1x1024xf32>
    %cst_17 = arith.constant 0.000000e+00 : f32
    %30 = vector.broadcast %cst_17 : f32 to vector<1x1024xf32>
    %31 = arith.subf %30, %29 : vector<1x1024xf32>
    %32 = math.exp %31 : vector<1x1024xf32>
    %cst_18 = arith.constant 1.000000e+00 : f32
    %33 = vector.broadcast %cst_18 : f32 to vector<1x1024xf32>
    %34 = arith.addf %33, %32 : vector<1x1024xf32>
    %35 = math.log %34 : vector<1x1024xf32>
    %36 = arith.addf %28, %35 : vector<1x1024xf32>
    %cst_19 = arith.constant 0.000000e+00 : f32
    %37 = vector.broadcast %cst_19 : f32 to vector<1x1024xf32>
    %38 = arith.subf %37, %36 : vector<1x1024xf32>
    %cst_20 = arith.constant -1.000000e+02 : f32
    %39 = vector.broadcast %cst_20 : f32 to vector<1x1024xf32>
    %40 = arith.maximumf %38, %39 : vector<1x1024xf32>
    %cst_21 = arith.constant 0.000000e+00 : f32
    %41 = vector.broadcast %cst_21 : f32 to vector<1x1024xf32>
    %42 = arith.maximumf %24, %41 : vector<1x1024xf32>
    %43 = math.absf %24 : vector<1x1024xf32>
    %cst_22 = arith.constant 0.000000e+00 : f32
    %44 = vector.broadcast %cst_22 : f32 to vector<1x1024xf32>
    %45 = arith.subf %44, %43 : vector<1x1024xf32>
    %46 = math.exp %45 : vector<1x1024xf32>
    %cst_23 = arith.constant 1.000000e+00 : f32
    %47 = vector.broadcast %cst_23 : f32 to vector<1x1024xf32>
    %48 = arith.addf %47, %46 : vector<1x1024xf32>
    %49 = math.log %48 : vector<1x1024xf32>
    %50 = arith.addf %42, %49 : vector<1x1024xf32>
    %cst_24 = arith.constant 0.000000e+00 : f32
    %51 = vector.broadcast %cst_24 : f32 to vector<1x1024xf32>
    %52 = arith.subf %51, %50 : vector<1x1024xf32>
    %cst_25 = arith.constant -1.000000e+02 : f32
    %53 = vector.broadcast %cst_25 : f32 to vector<1x1024xf32>
    %54 = arith.maximumf %52, %53 : vector<1x1024xf32>
    %55 = vector.shape_cast %40 : vector<1x1024xf32> to vector<1x1x1024xf32>
    %cst_26 = arith.constant dense<0.000000e+00> : vector<1xf32>
    %56 = vector.multi_reduction <add>, %55, %cst_26 [1, 2] : vector<1x1x1024xf32> to vector<1xf32>
    %57 = vector.shape_cast %56 : vector<1xf32> to vector<1x1x1xf32>
    %58 = vector.extract %57[0, 0, 0] : f32 from vector<1x1x1xf32>
    %59 = vector.broadcast %58 : f32 to vector<1x1xf32>
    %60 = vector.shape_cast %54 : vector<1x1024xf32> to vector<1x1x1024xf32>
    %cst_27 = arith.constant dense<0.000000e+00> : vector<1xf32>
    %61 = vector.multi_reduction <add>, %60, %cst_27 [1, 2] : vector<1x1x1024xf32> to vector<1xf32>
    %62 = vector.shape_cast %61 : vector<1xf32> to vector<1x1x1xf32>
    %63 = vector.extract %62[0, 0, 0] : f32 from vector<1x1x1xf32>
    %64 = vector.broadcast %63 : f32 to vector<1x1xf32>
    %65 = tpu.iota {dimensions = array<i32: 0>} : vector<8x128xi32>
    %66 = tpu.iota {dimensions = array<i32: 1>} : vector<8x128xi32>
    %c0_i32 = arith.constant 0 : i32
    %67 = vector.broadcast %c0_i32 : i32 to vector<8x128xi32>
    %68 = arith.cmpi eq, %65, %67 : vector<8x128xi32>
    %c0_i32_28 = arith.constant 0 : i32
    %69 = vector.broadcast %c0_i32_28 : i32 to vector<8x128xi32>
    %70 = arith.cmpi eq, %66, %69 : vector<8x128xi32>
    %71 = arith.andi %68, %70 : vector<8x128xi1>
    %c0_i32_29 = arith.constant 0 : i32
    %72 = vector.broadcast %c0_i32_29 : i32 to vector<8x128xi32>
    %73 = arith.cmpi eq, %65, %72 : vector<8x128xi32>
    %c1_i32 = arith.constant 1 : i32
    %74 = vector.broadcast %c1_i32 : i32 to vector<8x128xi32>
    %75 = arith.cmpi eq, %66, %74 : vector<8x128xi32>
    %76 = arith.andi %73, %75 : vector<8x128xi1>
    %cst_30 = arith.constant 0.000000e+00 : f32
    %77 = vector.shape_cast %64 : vector<1x1xf32> to vector<1x1xf32>
    %78 = vector.broadcast %77 : vector<1x1xf32> to vector<8x128xf32>
    %79 = vector.broadcast %cst_30 : f32 to vector<8x128xf32>
    %80 = arith.select %76, %78, %79 : vector<8x128xi1>, vector<8x128xf32>
    %81 = vector.shape_cast %59 : vector<1x1xf32> to vector<1x1xf32>
    %82 = vector.broadcast %81 : vector<1x1xf32> to vector<8x128xf32>
    %83 = arith.select %71, %82, %80 : vector<8x128xi1>, vector<8x128xf32>
    %c0_31 = arith.constant 0 : index
    %c0_32 = arith.constant 0 : index
    %84 = vector.load %arg8[%c0_31, %c0_32] : memref<8x128xf32, #tpu.memory_space<vmem>>, vector<8x128xf32>
    tpu.vector_store %arg8[%c0_31, %c0_32], %83 {strides = array<i32>} : memref<8x128xf32, #tpu.memory_space<vmem>>, vector<8x128xf32>,
    return
  }
  func.func @transform_0(%arg0: i32) -> (i32, i32) {
    %c0_i32 = arith.constant 0 : i32
    %c0_i32_0 = arith.constant 0 : i32
    return %arg0, %c0_i32 : i32, i32
  }
  func.func @transform_1(%arg0: i32) -> (i32, i32) {
    %c0_i32 = arith.constant 0 : i32
    %c0_i32_0 = arith.constant 0 : i32
    %c0_i32_1 = arith.constant 0 : i32
    return %c0_i32, %c0_i32_0 : i32, i32
  }
  func.func @transform_2(%arg0: i32) -> (i32, i32) {
    %c0_i32 = arith.constant 0 : i32
    %c0_i32_0 = arith.constant 0 : i32
    %c0_i32_1 = arith.constant 0 : i32
    return %c0_i32, %c0_i32_0 : i32, i32
  }
  func.func @transform_3(%arg0: i32) -> (i32, i32) {
    %c0_i32 = arith.constant 0 : i32
    %c0_i32_0 = arith.constant 0 : i32
    %c0_i32_1 = arith.constant 0 : i32
    return %c0_i32, %c0_i32_0 : i32, i32
  }
  func.func @transform_4(%arg0: i32) -> (i32, i32) {
    %c0_i32 = arith.constant 0 : i32
    %c0_i32_0 = arith.constant 0 : i32
    %c0_i32_1 = arith.constant 0 : i32
    return %c0_i32, %c0_i32_0 : i32, i32
  }
  func.func @transform_5(%arg0: i32) -> (i32, i32) {
    %c0_i32 = arith.constant 0 : i32
    %c0_i32_0 = arith.constant 0 : i32
    %c0_i32_1 = arith.constant 0 : i32
    return %c0_i32, %c0_i32_0 : i32, i32
  }
  func.func @transform_6(%arg0: i32) -> i32 {
    %c0_i32 = arith.constant 0 : i32
    %c0_i32_0 = arith.constant 0 : i32
    return %c0_i32 : i32
  }
  func.func @transform_7(%arg0: i32) -> (i32, i32) {
    %c0_i32 = arith.constant 0 : i32
    %c0_i32_0 = arith.constant 0 : i32
    return %arg0, %c0_i32 : i32, i32
  }
}

</mosaic_0001>

<bundles_post_ra>
// kernel: tpu_custom_call.1
= control target key start
LH: loop header
LB: loop body
LE: loop exit
PB: predicated region body
PF: predicated region fallthrough
CT: control target
= control target key end

     0   :  { %13 = vsyncpa [#allocation4], 0  ;;  %s4377_s0 = inlined_call_operand.hbm [shape: f32[1024,128], index: 0, kind: input, shape index: {}]   ;;  %s4378_s1 = inlined_call_operand.hbm [shape: bf16[128,128], index: 1, kind: input, shape index: {}]   ;;  %s4379_s2 = inlined_call_operand.vmem [shape: f32[1,128], index: 2, kind: input, shape index: {}]   ;;  %s4380_s3 = inlined_call_operand.hbm [shape: bf16[128,128], index: 3, kind: input, shape index: {}]   ;;  %s4381_s4 = inlined_call_operand.vmem [shape: f32[1,128], index: 4, kind: input, shape index: {}]   ;;  %s4382_s5 = inlined_call_operand.vmem [shape: f32[1,128], index: 5, kind: input, shape index: {}]   ;;  %s4383_s6 = inlined_call_operand.<no memory space> [shape: f32[1], index: 6, kind: input, shape index: {}]   ;;  %s4384_s7 = inlined_call_operand.hbm [shape: f32[8,128], index: 7, kind: output, shape index: {}]  }
   0x1   :  { %14 = vsyncpa [#allocation7], 0 }
   0x2   :  { %15 = vsyncpa [#allocation5], 0  ;;  %s3375_s24 = smov [#allocation6]  }
   0x3   :  { %s33_s25 = sshll.u32 %s3375_s24, 4  ;;  %s34_s25 = int_to_ptr.vmem [resolvable:$true] %s33_s25 }
   0x4   :  { %s3297_s26 = scalar_lea.vmem %s34_s25, 1024  ;;  %p3302_p1 = scmp.lt.s32.totalorder %s34_s25, %s34_s25 }
   0x5   :  { %p3298_p0 = scmp.ne.s32.totalorder %s34_s25, %s3297_s26  ;;  %p3303_p2 = scmp.lt.s32.totalorder %s3297_s26, %s3297_s26 }
   0x7   :  { %p3304_p3 = por %p3303_p2, %p3302_p1 }
   0x9   :  { %p3305_p4 = pnand %p3304_p3, %p3298_p0 }
   0xb   :  { %3308 = shalt.err (!%p3305_p4)
}
   0xc   :  { %s3376_s27 = smov 64   ;;  %s3377_s28 = smov 4  }
   0xd   :  { %39 = dma.hbm_to_vmem [thread:$0]  %s4378_s1, 1024, %s34_s25, [#allocation7], %s3376_s27, %s3376_s27, %s3377_s28  }
   0xe   :  { %s3378_s8 = smov [#allocation3]  }
   0xf   :  { %s21_s9 = sshll.u32 %s3378_s8, 4  ;;  %s22_s9 = int_to_ptr.vmem [resolvable:$true] %s21_s9 }
  0x10   :  { %s3317_s10 = scalar_lea.vmem %s22_s9, 16384  ;;  %p3322_p6 = scmp.lt.s32.totalorder %s22_s9, %s22_s9 }
  0x11   :  { %p3318_p5 = scmp.ne.s32.totalorder %s22_s9, %s3317_s10  ;;  %p3323_p7 = scmp.lt.s32.totalorder %s3317_s10, %s3317_s10 }
  0x13   :  { %p3324_p8 = por %p3323_p7, %p3322_p6 }
  0x15   :  { %p3325_p9 = pnand %p3324_p8, %p3318_p5 }
  0x17   :  { %3328 = shalt.err (!%p3325_p9)
}
  0x18   :  { %s3379_s11 = smov 128   ;;  %s3380_s12 = smov 8  }
  0x19   :  { %27 = dma.hbm_to_vmem [thread:$0]  %s4377_s0, 16384, %s22_s9, [#allocation4], %s3379_s11, %s3379_s11, %s3380_s12  }
  0x1a   :  { %s3381_s15 = smov [#allocation8]  }
  0x1b   :  { %s47_s16 = sshll.u32 %s3381_s15, 4  ;;  %s48_s16 = int_to_ptr.vmem [resolvable:$true] %s47_s16 }
  0x1c   :  { %s3337_s1 = scalar_lea.vmem %s48_s16, 1024  ;;  %p3342_p11 = scmp.lt.s32.totalorder %s48_s16, %s48_s16 }
  0x1d   :  { %p3338_p10 = scmp.ne.s32.totalorder %s48_s16, %s3337_s1  ;;  %p3343_p12 = scmp.lt.s32.totalorder %s3337_s1, %s3337_s1 }
  0x1f   :  { %p3344_p13 = por %p3343_p12, %p3342_p11 }
  0x21   :  { %p3345_p0 = pnand %p3344_p13, %p3338_p10 }
  0x23   :  { %3348 = shalt.err (!%p3345_p0)
}
  0x24   :  { %53 = dma.hbm_to_vmem [thread:$0]  %s4380_s3, 1024, %s48_s16, [#allocation7], %s3376_s27, %s3376_s27, %s3377_s28  }
  0x25   :  { %3369 = dma.done.wait [#allocation4], 16384  }
  0x26   :  { %3370 = vsyncadd [#allocation4], 4294950912 }
  0x27   :  { %3371 = dma.done.wait [#allocation7], 2048  }
  0x28   :  { %3372 = vsyncadd [#allocation7], 4294965248  ;;  %v2951_v0 = vld [vmem:[#allocation6 + $0x38] sm:$0xff]   ;;  %v2952_v1 = vld [vmem:[#allocation6 + $0x30] sm:$0xff]   ;;  %vm2266_vm0 = vcmask 1040384   ;;  %s3382_s26 = smov [#allocation9]  }
  0x29   :  { %2651 = vmatprep.subr.bf16.mxu0 %v2951_v0  ;;  %v2953_v2 = vld [vmem:[#allocation6 + $0x28] sm:$0xff]   ;;  %v2954_v3 = vld [vmem:[#allocation6 + $0x20] sm:$0xff]   ;;  %v2955_v7 = vld [vmem:[#allocation6 + $0x18] sm:$0xff]   ;;  %s2335_s27 = sshll.u32 %s3382_s26, 4  ;;  %s2336_s27 = int_to_ptr.vmem [resolvable:$true] %s2335_s27 }
  0x2a   :  { %2652 = vmatpush3.bf16.msra.mxu0 %v2951_v0  ;;  %v70_v4 = vld [vmem:[#allocation3] sm:$0xff]  ;;  %v71_v5 = vld [vmem:[#allocation3 + $0x8] sm:$0xff]  ;;  %v2956_v8 = vld [vmem:[#allocation6 + $0x10] sm:$0xff]   ;;  %s3349_s29 = scalar_lea.vmem %s2336_s27, 128  ;;  %p3354_p2 = scmp.lt.s32.totalorder %s2336_s27, %s2336_s27 }
  0x2b   :  { %2653 = vmatprep.subr.bf16.mxu0 %v2952_v1  ;;  %v198_v6 = vpack.c.bf16 %v71_v5, %v70_v4  ;;  %v2957_v9 = vld [vmem:[#allocation6 + $0x8] sm:$0xff]   ;;  %v2958_v10 = vld [vmem:[#allocation6] sm:$0xff]   ;;  %v72_v11 = vld [vmem:[#allocation3 + $0x10] sm:$0xff]  ;;  %p3350_p1 = scmp.ne.s32.totalorder %s2336_s27, %s3349_s29  ;;  %p3355_p3 = scmp.lt.s32.totalorder %s3349_s29, %s3349_s29 }
  0x2c   :  { %v73_v12 = vld [vmem:[#allocation3 + $0x18] sm:$0xff]  ;;  %v74_v13 = vld [vmem:[#allocation3 + $0x20] sm:$0xff]  ;;  %v75_v14 = vld [vmem:[#allocation3 + $0x28] sm:$0xff] }
  0x2d   :  { %2667 = vmatprep.mubr.bf16.mxu0 %v198_v6  ;;  %v199_v15 = vpack.c.bf16 %v73_v12, %v72_v11  ;;  %v200_v16 = vpack.c.bf16 %v75_v14, %v74_v13  ;;  %v76_v17 = vld [vmem:[#allocation3 + $0x30] sm:$0xff]  ;;  %v77_v18 = vld [vmem:[#allocation3 + $0x38] sm:$0xff]  ;;  %v78_v19 = vld [vmem:[#allocation3 + $0x40] sm:$0xff]  ;;  %p3356_p4 = por %p3355_p3, %p3354_p2 }
  0x2e   :  { %2654 = vmatpush3.bf16.msra.mxu0 %v2952_v1  ;;  %v79_v20 = vld [vmem:[#allocation3 + $0x48] sm:$0xff]  ;;  %v201_v21 = vpack.c.bf16 %v77_v18, %v76_v17  ;;  %v80_v23 = vld [vmem:[#allocation3 + $0x50] sm:$0xff]  ;;  %v81_v24 = vld [vmem:[#allocation3 + $0x58] sm:$0xff] }
  0x2f   :  { %2655 = vmatprep.subr.bf16.mxu0 %v2953_v2  ;;  %v202_v22 = vpack.c.bf16 %v79_v20, %v78_v19  ;;  %v82_v25 = vld [vmem:[#allocation3 + $0x60] sm:$0xff]  ;;  %v83_v26 = vld [vmem:[#allocation3 + $0x68] sm:$0xff]  ;;  %v203_v27 = vpack.c.bf16 %v81_v24, %v80_v23  ;;  %v84_v29 = vld [vmem:[#allocation3 + $0x70] sm:$0xff]  ;;  %p3357_p5 = pnand %p3356_p4, %p3350_p1 }
  0x30   :  { %v204_v28 = vpack.c.bf16 %v83_v26, %v82_v25  ;;  %v85_v30 = vld [vmem:[#allocation3 + $0x78] sm:$0xff]  ;;  %v86_v31 = vld [vmem:[#allocation3 + $0x80] sm:$0xff]  ;;  %v87_v32 = vld [vmem:[#allocation3 + $0x88] sm:$0xff] }
  0x31   :  { %v205_v33 = vpack.c.bf16 %v85_v30, %v84_v29  ;;  %v206_v34 = vpack.c.bf16 %v87_v32, %v86_v31  ;;  %v88_v35 = vld [vmem:[#allocation3 + $0x90] sm:$0xff]  ;;  %v89_v36 = vld [vmem:[#allocation3 + $0x98] sm:$0xff]  ;;  %v90_v37 = vld [vmem:[#allocation3 + $0xa0] sm:$0xff] }
  0x32   :  { %2656 = vmatpush3.bf16.msra.mxu0 %v2953_v2  ;;  %v91_v38 = vld [vmem:[#allocation3 + $0xa8] sm:$0xff]  ;;  %v207_v39 = vpack.c.bf16 %v89_v36, %v88_v35  ;;  %v92_v41 = vld [vmem:[#allocation3 + $0xb0] sm:$0xff]  ;;  %v93_v42 = vld [vmem:[#allocation3 + $0xb8] sm:$0xff] }
  0x33   :  { %2657 = vmatprep.subr.bf16.mxu0 %v2954_v3  ;;  %v208_v40 = vpack.c.bf16 %v91_v38, %v90_v37  ;;  %v94_v43 = vld [vmem:[#allocation3 + $0xc0] sm:$0xff]  ;;  %v95_v44 = vld [vmem:[#allocation3 + $0xc8] sm:$0xff]  ;;  %v209_v45 = vpack.c.bf16 %v93_v42, %v92_v41  ;;  %v96_v47 = vld [vmem:[#allocation3 + $0xd0] sm:$0xff] }
  0x34   :  { %v210_v46 = vpack.c.bf16 %v95_v44, %v94_v43  ;;  %v97_v48 = vld [vmem:[#allocation3 + $0xd8] sm:$0xff]  ;;  %v98_v49 = vld [vmem:[#allocation3 + $0xe0] sm:$0xff]  ;;  %v99_v50 = vld [vmem:[#allocation3 + $0xe8] sm:$0xff] }
  0x35   :  { %v211_v51 = vpack.c.bf16 %v97_v48, %v96_v47  ;;  %v212_v52 = vpack.c.bf16 %v99_v50, %v98_v49  ;;  %v100_v53 = vld [vmem:[#allocation3 + $0xf0] sm:$0xff]  ;;  %v101_v54 = vld [vmem:[#allocation3 + $0xf8] sm:$0xff]  ;;  %v102_v55 = vld [vmem:[#allocation3 + $0x100] sm:$0xff] }
  0x36   :  { %2658 = vmatpush3.bf16.msra.mxu0 %v2954_v3  ;;  %v103_v56 = vld [vmem:[#allocation3 + $0x108] sm:$0xff]  ;;  %v213_v57 = vpack.c.bf16 %v101_v54, %v100_v53  ;;  %v2959_v59 = vld [vmem:[#allocation8 + $0x38] sm:$0xff]   ;;  %v104_v60 = vld [vmem:[#allocation3 + $0x110] sm:$0xff] }
  0x37   :  { %2659 = vmatprep.subr.bf16.mxu0 %v2955_v7  ;;  %v214_v58 = vpack.c.bf16 %v103_v56, %v102_v55  ;;  %v105_v61 = vld [vmem:[#allocation3 + $0x118] sm:$0xff]  ;;  %v2960_v62 = vld [vmem:[#allocation8 + $0x30] sm:$0xff]   ;;  %v106_v63 = vld [vmem:[#allocation3 + $0x120] sm:$0xff]  ;;  %2795 = vmatprep.subr.bf16.mxu1 %v2959_v59 }
  0x38   :  { %v107_v0 = vld [vmem:[#allocation3 + $0x128] sm:$0xff]  ;;  %2796 = vmatpush3.bf16.msra.mxu1 %v2959_v59  ;;  %v215_v1 = vpack.c.bf16 %v105_v61, %v104_v60  ;;  %v108_v3 = vld [vmem:[#allocation3 + $0x130] sm:$0xff]  ;;  %v109_v4 = vld [vmem:[#allocation3 + $0x138] sm:$0xff] }
  0x39   :  { %2797 = vmatprep.subr.bf16.mxu1 %v2960_v62  ;;  %v216_v2 = vpack.c.bf16 %v107_v0, %v106_v63  ;;  %v2961_v5 = vld [vmem:[#allocation8 + $0x28] sm:$0xff]   ;;  %v110_v6 = vld [vmem:[#allocation3 + $0x140] sm:$0xff]  ;;  %v112_v11 = vld [vmem:[#allocation3 + $0x150] sm:$0xff] }
  0x3a   :  { %2660 = vmatpush3.bf16.msra.mxu0 %v2955_v7  ;;  %v111_v7 = vld [vmem:[#allocation3 + $0x148] sm:$0xff]  ;;  %v113_v12 = vld [vmem:[#allocation3 + $0x158] sm:$0xff]  ;;  %v114_v14 = vld [vmem:[#allocation3 + $0x160] sm:$0xff] }
  0x3b   :  { %2661 = vmatprep.subr.bf16.mxu0 %v2956_v8  ;;  %v2963_v13 = vld [vmem:[#allocation8 + $0x18] sm:$0xff]   ;;  %v2964_v18 = vld [vmem:[#allocation8 + $0x10] sm:$0xff]   ;;  %v119_v23 = vld [vmem:[#allocation3 + $0x188] sm:$0xff] }
  0x3c   :  { %2798 = vmatpush3.bf16.msra.mxu1 %v2960_v62  ;;  %v116_v19 = vld [vmem:[#allocation3 + $0x170] sm:$0xff]  ;;  %v117_v20 = vld [vmem:[#allocation3 + $0x178] sm:$0xff]  ;;  %v2966_v26 = vld [vmem:[#allocation8] sm:$0xff]  }
  0x3d   :  { %2799 = vmatprep.subr.bf16.mxu1 %v2961_v5  ;;  %v221_v24 = vpack.c.bf16 %v117_v20, %v116_v19  ;;  %v122_v29 = vld [vmem:[#allocation3 + $0x1a0] sm:$0xff]  ;;  %v123_v30 = vld [vmem:[#allocation3 + $0x1a8] sm:$0xff]  ;;  %v144_v63 = vld [vmem:[#allocation3 + $0x250] sm:$0xff] }
  0x3e   :  { %2662 = vmatpush3.bf16.msra.mxu0 %v2956_v8  ;;  %v217_v8 = vpack.c.bf16 %v109_v4, %v108_v3  ;;  %v224_v32 = vpack.c.bf16 %v123_v30, %v122_v29  ;;  %v126_v35 = vld [vmem:[#allocation3 + $0x1c0] sm:$0xff]  ;;  %v127_v36 = vld [vmem:[#allocation3 + $0x1c8] sm:$0xff]  ;;  %v145_v0 = vld [vmem:[#allocation3 + $0x258] sm:$0xff] }
  0x3f   :  { %2663 = vmatprep.subr.bf16.mxu0 %v2957_v9  ;;  %v226_v38 = vpack.c.bf16 %v127_v36, %v126_v35  ;;  %v130_v41 = vld [vmem:[#allocation3 + $0x1e0] sm:$0xff]  ;;  %v131_v42 = vld [vmem:[#allocation3 + $0x1e8] sm:$0xff]  ;;  %v235_v3 = vpack.c.bf16 %v145_v0, %v144_v63  ;;  %v164_v29 = vld [vmem:[#allocation3 + $0x2f0] sm:$0xff] }
  0x40   :  { %2800 = vmatpush3.bf16.msra.mxu1 %v2961_v5  ;;  %v228_v44 = vpack.c.bf16 %v131_v42, %v130_v41  ;;  %v134_v47 = vld [vmem:[#allocation3 + $0x200] sm:$0xff]  ;;  %v135_v48 = vld [vmem:[#allocation3 + $0x208] sm:$0xff]  ;;  %v148_v5 = vld [vmem:[#allocation3 + $0x270] sm:$0xff] }
  0x41   :  { %v230_v50 = vpack.c.bf16 %v135_v48, %v134_v47  ;;  %v138_v53 = vld [vmem:[#allocation3 + $0x220] sm:$0xff]  ;;  %v139_v54 = vld [vmem:[#allocation3 + $0x228] sm:$0xff]  ;;  %v165_v30 = vld [vmem:[#allocation3 + $0x2f8] sm:$0xff] }
  0x42   :  { %2664 = vmatpush3.bf16.msra.mxu0 %v2957_v9  ;;  %v218_v9 = vpack.c.bf16 %v111_v7, %v110_v6  ;;  %v232_v56 = vpack.c.bf16 %v139_v54, %v138_v53  ;;  %v142_v59 = vld [vmem:[#allocation3 + $0x240] sm:$0xff]  ;;  %v143_v60 = vld [vmem:[#allocation3 + $0x248] sm:$0xff]  ;;  %v149_v6 = vld [vmem:[#allocation3 + $0x278] sm:$0xff] }
  0x43   :  { %2665 = vmatprep.subr.bf16.mxu0 %v2958_v10  ;;  %v234_v62 = vpack.c.bf16 %v143_v60, %v142_v59  ;;  %v150_v7 = vld [vmem:[#allocation3 + $0x280] sm:$0xff]  ;;  %v159_v20 = vld [vmem:[#allocation3 + $0x2c8] sm:$0xff]  ;;  %v168_v35 = vld [vmem:[#allocation3 + $0x310] sm:$0xff] }
  0x44   :  { %v158_v19 = vld [vmem:[#allocation3 + $0x2c0] sm:$0xff]  ;;  %v169_v36 = vld [vmem:[#allocation3 + $0x318] sm:$0xff]  ;;  %v172_v42 = vld [vmem:[#allocation3 + $0x330] sm:$0xff] }
  0x45   :  { %v3435_v47 = vld [vmem:[%s4379_s2] ss:$0 sm:$0xff]  ;;  %v176_v59 = vld [vmem:[#allocation3 + $0x350] sm:$0xff]  ;;  %v177_v60 = vld [vmem:[#allocation3 + $0x358] sm:$0xff] }
  0x46   :  { %2666 = vmatpush3.bf16.msra.mxu0 %v2958_v10  ;;  %v2962_v10 = vld [vmem:[#allocation8 + $0x20] sm:$0xff]   ;;  %v179_v63 = vld [vmem:[#allocation3 + $0x368] sm:$0xff] }
  0x47   :  { %2801 = vmatprep.subr.bf16.mxu1 %v2962_v10 }
  0x48   :  { %2802 = vmatpush3.bf16.msra.mxu1 %v2962_v10 }
  0x49   :  { %2668 = vmatmul.mubr.bf16.vlgmr.msra.gmra.mxu0 %v199_v15  ;;  %v115_v15 = vld [vmem:[#allocation3 + $0x168] sm:$0xff]  ;;  %2803 = vmatprep.subr.bf16.mxu1 %v2963_v13 }
  0x4a   :  { %2671 = vmatprep.mubr.bf16.mxu0 %v200_v16  ;;  %v219_v16 = vpack.c.bf16 %v113_v12, %v112_v11  ;;  %v220_v17 = vpack.c.bf16 %v115_v15, %v114_v14  ;;  %v152_v11 = vld [vmem:[#allocation3 + $0x290] sm:$0xff]  ;;  %v153_v12 = vld [vmem:[#allocation3 + $0x298] sm:$0xff]  ;;  %v155_v14 = vld [vmem:[#allocation3 + $0x2a8] sm:$0xff] }
  0x4b   :  { %v239_v15 = vpack.c.bf16 %v153_v12, %v152_v11  ;;  %v180_v11 = vld [vmem:[#allocation3 + $0x370] sm:$0xff]  ;;  %v181_v12 = vld [vmem:[#allocation3 + $0x378] sm:$0xff] }
  0x4c   :  { %2804 = vmatpush3.bf16.msra.mxu1 %v2963_v13  ;;  %v154_v13 = vld [vmem:[#allocation3 + $0x2a0] sm:$0xff] }
  0x4d   :  { %2805 = vmatprep.subr.bf16.mxu1 %v2964_v18 }
  0x50   :  { %2806 = vmatpush3.bf16.msra.mxu1 %v2964_v18  ;;  %v157_v18 = vld [vmem:[#allocation3 + $0x2b8] sm:$0xff] }
  0x51   :  { %2672 = vmatmul.mubr.bf16.gmra.mxu0 %v201_v21  ;;  %v2965_v21 = vld [vmem:[#allocation8 + $0x8] sm:$0xff]  }
  0x52   :  { %2675 = vmatprep.mubr.bf16.mxu0 %v202_v22  ;;  %v118_v22 = vld [vmem:[#allocation3 + $0x180] sm:$0xff]  ;;  %2807 = vmatprep.subr.bf16.mxu1 %v2965_v21 }
  0x53   :  { %v222_v25 = vpack.c.bf16 %v119_v23, %v118_v22  ;;  %v242_v22 = vpack.c.bf16 %v159_v20, %v158_v19  ;;  %v160_v23 = vld [vmem:[#allocation3 + $0x2d0] sm:$0xff] }
  0x54   :  { %2808 = vmatpush3.bf16.msra.mxu1 %v2965_v21 }
  0x55   :  { %2809 = vmatprep.subr.bf16.mxu1 %v2966_v26 }
  0x58   :  { %2810 = vmatpush3.bf16.msra.mxu1 %v2966_v26  ;;  %v163_v26 = vld [vmem:[#allocation3 + $0x2e8] sm:$0xff] }
  0x59   :  { %2676 = vmatmul.mubr.bf16.gmra.mxu0 %v203_v27  ;;  %v120_v27 = vld [vmem:[#allocation3 + $0x190] sm:$0xff] }
  0x5a   :  { %2679 = vmatprep.mubr.bf16.mxu0 %v204_v28  ;;  %v121_v28 = vld [vmem:[#allocation3 + $0x198] sm:$0xff] }
  0x5b   :  { %v223_v31 = vpack.c.bf16 %v121_v28, %v120_v27 }
  0x61   :  { %2680 = vmatmul.mubr.bf16.gmra.mxu0 %v205_v33  ;;  %v124_v33 = vld [vmem:[#allocation3 + $0x1b0] sm:$0xff] }
  0x62   :  { %2683 = vmatprep.mubr.bf16.mxu0 %v206_v34  ;;  %v125_v34 = vld [vmem:[#allocation3 + $0x1b8] sm:$0xff] }
  0x63   :  { %v225_v37 = vpack.c.bf16 %v125_v34, %v124_v33  ;;  %v245_v33 = vpack.c.bf16 %v165_v30, %v164_v29  ;;  %v185_v29 = vld [vmem:[#allocation3 + $0x398] sm:$0xff] }
  0x69   :  { %2684 = vmatmul.mubr.bf16.gmra.mxu0 %v207_v39  ;;  %v128_v39 = vld [vmem:[#allocation3 + $0x1d0] sm:$0xff] }
  0x6a   :  { %2687 = vmatprep.mubr.bf16.mxu0 %v208_v40  ;;  %v129_v40 = vld [vmem:[#allocation3 + $0x1d8] sm:$0xff] }
  0x6b   :  { %v227_v43 = vpack.c.bf16 %v129_v40, %v128_v39  ;;  %v247_v39 = vpack.c.bf16 %v169_v36, %v168_v35 }
  0x71   :  { %2688 = vmatmul.mubr.bf16.gmra.mxu0 %v209_v45  ;;  %v132_v45 = vld [vmem:[#allocation3 + $0x1f0] sm:$0xff] }
  0x72   :  { %2691 = vmatprep.mubr.bf16.mxu0 %v210_v46  ;;  %v133_v46 = vld [vmem:[#allocation3 + $0x1f8] sm:$0xff] }
  0x73   :  { %v229_v49 = vpack.c.bf16 %v133_v46, %v132_v45  ;;  %v174_v45 = vld [vmem:[#allocation3 + $0x340] sm:$0xff]  ;;  %v175_v46 = vld [vmem:[#allocation3 + $0x348] sm:$0xff] }
  0x79   :  { %2692 = vmatmul.mubr.bf16.gmra.mxu0 %v211_v51  ;;  %v136_v51 = vld [vmem:[#allocation3 + $0x210] sm:$0xff] }
  0x7a   :  { %2695 = vmatprep.mubr.bf16.mxu0 %v212_v52  ;;  %v137_v52 = vld [vmem:[#allocation3 + $0x218] sm:$0xff] }
  0x7b   :  { %v231_v55 = vpack.c.bf16 %v137_v52, %v136_v51  ;;  %v250_v51 = vpack.c.bf16 %v175_v46, %v174_v45  ;;  %v188_v46 = vld [vmem:[#allocation3 + $0x3b0] sm:$0xff] }
  0x81   :  { %2696 = vmatmul.mubr.bf16.gmra.mxu0 %v213_v57  ;;  %v140_v57 = vld [vmem:[#allocation3 + $0x230] sm:$0xff] }
  0x82   :  { %2699 = vmatprep.mubr.bf16.mxu0 %v214_v58  ;;  %v141_v58 = vld [vmem:[#allocation3 + $0x238] sm:$0xff] }
  0x83   :  { %v233_v61 = vpack.c.bf16 %v141_v58, %v140_v57 }
  0x89   :  { %2700 = vmatmul.mubr.bf16.gmra.mxu0 %v215_v1  ;;  %v146_v1 = vld [vmem:[#allocation3 + $0x260] sm:$0xff] }
  0x8a   :  { %2703 = vmatprep.mubr.bf16.mxu0 %v216_v2  ;;  %v147_v2 = vld [vmem:[#allocation3 + $0x268] sm:$0xff] }
  0x8b   :  { %v236_v4 = vpack.c.bf16 %v147_v2, %v146_v1  ;;  %v251_v1 = vpack.c.bf16 %v177_v60, %v176_v59 }
  0x91   :  { %2704 = vmatmul.mubr.bf16.gmra.mxu0 %v217_v8  ;;  %v151_v8 = vld [vmem:[#allocation3 + $0x288] sm:$0xff] }
  0x92   :  { %2707 = vmatprep.mubr.bf16.mxu0 %v218_v9  ;;  %v237_v9 = vpack.c.bf16 %v149_v6, %v148_v5  ;;  %v238_v10 = vpack.c.bf16 %v151_v8, %v150_v7 }
  0x99   :  { %2708 = vmatmul.mubr.bf16.gmra.mxu0 %v219_v16  ;;  %v240_v16 = vpack.c.bf16 %v155_v14, %v154_v13  ;;  %v182_v14 = vld [vmem:[#allocation3 + $0x380] sm:$0xff] }
  0x9a   :  { %2711 = vmatprep.mubr.bf16.mxu0 %v220_v17  ;;  %v156_v17 = vld [vmem:[#allocation3 + $0x2b0] sm:$0xff] }
  0x9b   :  { %v241_v21 = vpack.c.bf16 %v157_v18, %v156_v17  ;;  %v253_v17 = vpack.c.bf16 %v181_v12, %v180_v11 }
  0xa1   :  { %2712 = vmatmul.mubr.bf16.gmra.mxu0 %v221_v24  ;;  %v161_v24 = vld [vmem:[#allocation3 + $0x2d8] sm:$0xff] }
  0xa2   :  { %2715 = vmatprep.mubr.bf16.mxu0 %v222_v25  ;;  %v162_v25 = vld [vmem:[#allocation3 + $0x2e0] sm:$0xff]  ;;  %v243_v27 = vpack.c.bf16 %v161_v24, %v160_v23 }
  0xa3   :  { %v244_v28 = vpack.c.bf16 %v163_v26, %v162_v25 }
  0xa9   :  { %2716 = vmatmul.mubr.bf16.gmra.mxu0 %v223_v31  ;;  %v166_v31 = vld [vmem:[#allocation3 + $0x300] sm:$0xff] }
  0xaa   :  { %2719 = vmatprep.mubr.bf16.mxu0 %v224_v32  ;;  %v167_v32 = vld [vmem:[#allocation3 + $0x308] sm:$0xff] }
  0xab   :  { %v246_v34 = vpack.c.bf16 %v167_v32, %v166_v31  ;;  %v186_v32 = vld [vmem:[#allocation3 + $0x3a0] sm:$0xff] }
  0xb1   :  { %2720 = vmatmul.mubr.bf16.gmra.mxu0 %v225_v37  ;;  %v170_v37 = vld [vmem:[#allocation3 + $0x320] sm:$0xff] }
  0xb2   :  { %2723 = vmatprep.mubr.bf16.mxu0 %v226_v38  ;;  %v171_v38 = vld [vmem:[#allocation3 + $0x328] sm:$0xff] }
  0xb3   :  { %v248_v40 = vpack.c.bf16 %v171_v38, %v170_v37 }
  0xb9   :  { %2724 = vmatmul.mubr.bf16.gmra.mxu0 %v227_v43  ;;  %v173_v43 = vld [vmem:[#allocation3 + $0x338] sm:$0xff] }
  0xba   :  { %2727 = vmatprep.mubr.bf16.mxu0 %v228_v44 }
  0xc1   :  { %2728 = vmatmul.mubr.bf16.gmra.mxu0 %v229_v49  ;;  %v249_v49 = vpack.c.bf16 %v173_v43, %v172_v42 }
  0xc2   :  { %2731 = vmatprep.mubr.bf16.mxu0 %v230_v50 }
  0xc9   :  { %2732 = vmatmul.mubr.bf16.gmra.mxu0 %v231_v55 }
  0xca   :  { %2735 = vmatprep.mubr.bf16.mxu0 %v232_v56 }
  0xd1   :  { %2736 = vmatmul.mubr.bf16.gmra.mxu0 %v233_v61 }
  0xd2   :  { %2739 = vmatprep.mubr.bf16.mxu0 %v234_v62  ;;  %v178_v62 = vld [vmem:[#allocation3 + $0x360] sm:$0xff] }
  0xd9   :  { %2740 = vmatmul.mubr.bf16.gmra.mxu0 %v235_v3  ;;  %v252_v3 = vpack.c.bf16 %v179_v63, %v178_v62 }
  0xda   :  { %2743 = vmatprep.mubr.bf16.mxu0 %v236_v4 }
  0xe1   :  { %2744 = vmatmul.mubr.bf16.gmra.mxu0 %v237_v9 }
  0xe2   :  { %2747 = vmatprep.mubr.bf16.mxu0 %v238_v10 }
  0xe9   :  { %2748 = vmatmul.mubr.bf16.gmra.mxu0 %v239_v15  ;;  %v183_v15 = vld [vmem:[#allocation3 + $0x388] sm:$0xff] }
  0xea   :  { %2751 = vmatprep.mubr.bf16.mxu0 %v240_v16  ;;  %v254_v19 = vpack.c.bf16 %v183_v15, %v182_v14 }
  0xf1   :  { %2752 = vmatmul.mubr.bf16.gmra.mxu0 %v241_v21 }
  0xf2   :  { %2755 = vmatprep.mubr.bf16.mxu0 %v242_v22 }
  0xf9   :  { %2756 = vmatmul.mubr.bf16.gmra.mxu0 %v243_v27 }
  0xfa   :  { %2759 = vmatprep.mubr.bf16.mxu0 %v244_v28  ;;  %v184_v28 = vld [vmem:[#allocation3 + $0x390] sm:$0xff] }
  0xfb   :  { %v255_v35 = vpack.c.bf16 %v185_v29, %v184_v28 }
 0x101   :  { %2760 = vmatmul.mubr.bf16.gmra.mxu0 %v245_v33  ;;  %v187_v33 = vld [vmem:[#allocation3 + $0x3a8] sm:$0xff] }
 0x102   :  { %2763 = vmatprep.mubr.bf16.mxu0 %v246_v34  ;;  %v256_v37 = vpack.c.bf16 %v187_v33, %v186_v32 }
 0x109   :  { %v2669_v41 = vpop.f32.mrf.mxu0  ;;  %2764 = vmatmul.mubr.bf16.gmra.mxu0 %v247_v39 }
 0x10a   :  { %2767 = vmatprep.mubr.bf16.mxu0 %v248_v40  ;;  %v376_v52 = vadd.f32 %v2669_v41, %v3435_v47 }
 0x10b   :  { %v367_v44 = vpop.f32.mrf.mxu0 }
 0x10c   :  { %v368_v54 = vadd.f32 %v3435_v47, %v367_v44 }
 0x10d   :  { %v2670_v48 = vpop.f32.mrf.mxu0 }
 0x10e   :  { %v379_v50 = vadd.f32 %v2670_v48, %v3435_v47  ;;  %v189_v48 = vld [vmem:[#allocation3 + $0x3b8] sm:$0xff] }
 0x10f   :  { %v370_v53 = vpop.f32.mrf.mxu0 }
 0x110   :  { %v371_v55 = vadd.f32 %v3435_v47, %v370_v53  ;;  %v879_v56 = vpack.c.bf16 %v379_v50, %v376_v52  ;;  %v191_v52 = vld [vmem:[#allocation3 + $0x3c8] sm:$0xff] }
 0x111   :  { %v2673_v57 = vpop.f32.mrf.mxu0  ;;  %2768 = vmatmul.mubr.bf16.gmra.mxu0 %v249_v49 }
 0x112   :  { %v878_v58 = vpack.c.bf16 %v371_v55, %v368_v54  ;;  %2771 = vmatprep.mubr.bf16.mxu0 %v250_v51  ;;  %v392_v4 = vadd.f32 %v2673_v57, %v3435_v47  ;;  %v190_v51 = vld [vmem:[#allocation3 + $0x3c0] sm:$0xff]  ;;  %v257_v54 = vpack.c.bf16 %v189_v48, %v188_v46 }
 0x113   :  { %v383_v61 = vpop.f32.mrf.mxu0 }
 0x114   :  { %2967 = vtanh.bf16 %v878_v58  ;;  %v384_v6 = vadd.f32 %v3435_v47, %v383_v61 }
 0x115   :  { %2969 = vtanh.bf16 %v879_v56  ;;  %v2674_v0 = vpop.f32.mrf.mxu0  ;;  %v258_v56 = vpack.c.bf16 %v191_v52, %v190_v51 }
 0x116   :  { %v395_v2 = vadd.f32 %v2674_v0, %v3435_v47 }
 0x117   :  { %v386_v5 = vpop.f32.mrf.mxu0 }
 0x118   :  { %v387_v7 = vadd.f32 %v3435_v47, %v386_v5  ;;  %v881_v8 = vpack.c.bf16 %v395_v2, %v392_v4  ;;  %v193_v2 = vld [vmem:[#allocation3 + $0x3d8] sm:$0xff]  ;;  %v194_v5 = vld [vmem:[#allocation3 + $0x3e0] sm:$0xff] }
 0x119   :  { %v2677_v9 = vpop.f32.mrf.mxu0  ;;  %2772 = vmatmul.mubr.bf16.gmra.mxu0 %v251_v1  ;;  %v192_v1 = vld [vmem:[#allocation3 + $0x3d0] sm:$0xff] }
 0x11a   :  { %v880_v10 = vpack.c.bf16 %v387_v7, %v384_v6  ;;  %2775 = vmatprep.mubr.bf16.mxu0 %v252_v3  ;;  %v408_v20 = vadd.f32 %v2677_v9, %v3435_v47  ;;  %v195_v6 = vld [vmem:[#allocation3 + $0x3e8] sm:$0xff] }
 0x11b   :  { %v399_v13 = vpop.f32.mrf.mxu0 }
 0x11c   :  { %2971 = vtanh.bf16 %v880_v10  ;;  %v400_v22 = vadd.f32 %v3435_v47, %v399_v13  ;;  %v260_v10 = vpack.c.bf16 %v195_v6, %v194_v5  ;;  %v1750_v5 = vld [vmem:[%s4382_s5] sm:$0x1] }
 0x11d   :  { %2973 = vtanh.bf16 %v881_v8  ;;  %v2678_v16 = vpop.f32.mrf.mxu0  ;;  %v259_v8 = vpack.c.bf16 %v193_v2, %v192_v1 }
 0x11e   :  { %v411_v18 = vadd.f32 %v2678_v16, %v3435_v47 }
 0x11f   :  { %v402_v21 = vpop.f32.mrf.mxu0 }
 0x120   :  { %v403_v23 = vadd.f32 %v3435_v47, %v402_v21  ;;  %v883_v24 = vpack.c.bf16 %v411_v18, %v408_v20  ;;  %v197_v20 = vld [vmem:[#allocation3 + $0x3f8] sm:$0xff] }
 0x121   :  { %v2681_v25 = vpop.f32.mrf.mxu0  ;;  %2776 = vmatmul.mubr.bf16.gmra.mxu0 %v253_v17 }
 0x122   :  { %v3449_v26 = vpop.eup %2967  ;;  %v882_v27 = vpack.c.bf16 %v403_v23, %v400_v22  ;;  %2779 = vmatprep.mubr.bf16.mxu0 %v254_v19  ;;  %v424_v38 = vadd.f32 %v2681_v25, %v3435_v47  ;;  %v196_v19 = vld [vmem:[#allocation3 + $0x3f0] sm:$0xff] }
 0x123   :  { %v3451_v30 = vpop.eup %2969  ;;  %v415_v31 = vpop.f32.mrf.mxu0  ;;  %2811 = vmatprep.mubr.bf16.mxu1 %v3449_v26 }
 0x124   :  { %2975 = vtanh.bf16 %v882_v27  ;;  %2812 = vmatmul.mubr.bf16.vlgmr.msra.gmra.mxu1 %v3451_v30  ;;  %v416_v40 = vadd.f32 %v3435_v47, %v415_v31 }
 0x125   :  { %2977 = vtanh.bf16 %v883_v24  ;;  %v2682_v34 = vpop.f32.mrf.mxu0  ;;  %v261_v24 = vpack.c.bf16 %v197_v20, %v196_v19 }
 0x126   :  { %v427_v36 = vadd.f32 %v2682_v34, %v3435_v47 }
 0x127   :  { %v418_v39 = vpop.f32.mrf.mxu0 }
 0x128   :  { %v419_v41 = vadd.f32 %v3435_v47, %v418_v39  ;;  %v885_v42 = vpack.c.bf16 %v427_v36, %v424_v38 }
 0x129   :  { %v2685_v43 = vpop.f32.mrf.mxu0  ;;  %2780 = vmatmul.mubr.bf16.gmra.mxu0 %v255_v35 }
 0x12a   :  { %v3459_v44 = vpop.eup %2971  ;;  %v884_v45 = vpack.c.bf16 %v419_v41, %v416_v40  ;;  %2783 = vmatprep.mubr.bf16.mxu0 %v256_v37  ;;  %v440_v57 = vadd.f32 %v2685_v43, %v3435_v47 }
 0x12b   :  { %v3461_v49 = vpop.eup %2973  ;;  %v431_v50 = vpop.f32.mrf.mxu0  ;;  %2815 = vmatprep.mubr.bf16.mxu1 %v3459_v44 }
 0x12c   :  { %2979 = vtanh.bf16 %v884_v45  ;;  %2816 = vmatmul.mubr.bf16.gmra.mxu1 %v3461_v49  ;;  %v432_v59 = vadd.f32 %v3435_v47, %v431_v50 }
 0x12d   :  { %2981 = vtanh.bf16 %v885_v42  ;;  %v2686_v53 = vpop.f32.mrf.mxu0 }
 0x12e   :  { %v443_v55 = vadd.f32 %v2686_v53, %v3435_v47 }
 0x12f   :  { %v434_v58 = vpop.f32.mrf.mxu0 }
 0x130   :  { %v435_v60 = vadd.f32 %v3435_v47, %v434_v58  ;;  %v887_v61 = vpack.c.bf16 %v443_v55, %v440_v57 }
 0x131   :  { %v2689_v62 = vpop.f32.mrf.mxu0  ;;  %2784 = vmatmul.mubr.bf16.gmra.mxu0 %v257_v54 }
 0x132   :  { %v3469_v63 = vpop.eup %2975  ;;  %v886_v0 = vpack.c.bf16 %v435_v60, %v432_v59  ;;  %2787 = vmatprep.mubr.bf16.mxu0 %v258_v56  ;;  %v456_v11 = vadd.f32 %v2689_v62, %v3435_v47 }
 0x133   :  { %v3471_v3 = vpop.eup %2977  ;;  %v447_v4 = vpop.f32.mrf.mxu0  ;;  %2819 = vmatprep.mubr.bf16.mxu1 %v3469_v63 }
 0x134   :  { %2983 = vtanh.bf16 %v886_v0  ;;  %2820 = vmatmul.mubr.bf16.gmra.mxu1 %v3471_v3  ;;  %v448_v13 = vadd.f32 %v3435_v47, %v447_v4 }
 0x135   :  { %2985 = vtanh.bf16 %v887_v61  ;;  %v2690_v7 = vpop.f32.mrf.mxu0 }
 0x136   :  { %v459_v9 = vadd.f32 %v2690_v7, %v3435_v47 }
 0x137   :  { %v450_v12 = vpop.f32.mrf.mxu0 }
 0x138   :  { %v451_v14 = vadd.f32 %v3435_v47, %v450_v12  ;;  %v889_v15 = vpack.c.bf16 %v459_v9, %v456_v11 }
 0x139   :  { %v2693_v16 = vpop.f32.mrf.mxu0  ;;  %2788 = vmatmul.mubr.bf16.gmra.mxu0 %v259_v8  ;;  %v3514_v8 = vpack.c.bf16 %v1750_v5, %v1750_v5 }
 0x13a   :  { %v3479_v17 = vpop.eup %2979  ;;  %v888_v18 = vpack.c.bf16 %v451_v14, %v448_v13  ;;  %2791 = vmatprep.mubr.bf16.mxu0 %v260_v10  ;;  %v472_v27 = vadd.f32 %v2693_v16, %v3435_v47 }
 0x13b   :  { %v3481_v21 = vpop.eup %2981  ;;  %v463_v22 = vpop.f32.mrf.mxu0  ;;  %2823 = vmatprep.mubr.bf16.mxu1 %v3479_v17 }
 0x13c   :  { %2987 = vtanh.bf16 %v888_v18  ;;  %2824 = vmatmul.mubr.bf16.gmra.mxu1 %v3481_v21  ;;  %v464_v29 = vadd.f32 %v3435_v47, %v463_v22 }
 0x13d   :  { %2989 = vtanh.bf16 %v889_v15  ;;  %v2694_v23 = vpop.f32.mrf.mxu0 }
 0x13e   :  { %v475_v25 = vadd.f32 %v2694_v23, %v3435_v47 }
 0x13f   :  { %v466_v28 = vpop.f32.mrf.mxu0 }
 0x140   :  { %v467_v31 = vadd.f32 %v3435_v47, %v466_v28  ;;  %v891_v32 = vpack.c.bf16 %v475_v25, %v472_v27 }
 0x141   :  { %v2697_v33 = vpop.f32.mrf.mxu0  ;;  %2792 = vmatmul.mubr.bf16.gmra.mxu0 %v261_v24 }
 0x142   :  { %v3489_v34 = vpop.eup %2983  ;;  %v890_v35 = vpack.c.bf16 %v467_v31, %v464_v29  ;;  %v488_v39 = vadd.f32 %v2697_v33, %v3435_v47  ;;  %2523 = vmatprep.mubr.bf16.mxu0 %v3514_v8 }
 0x143   :  { %v3491_v36 = vpop.eup %2985  ;;  %v479_v37 = vpop.f32.mrf.mxu0  ;;  %2827 = vmatprep.mubr.bf16.mxu1 %v3489_v34 }
 0x144   :  { %2991 = vtanh.bf16 %v890_v35  ;;  %2828 = vmatmul.mubr.bf16.gmra.mxu1 %v3491_v36  ;;  %v480_v42 = vadd.f32 %v3435_v47, %v479_v37 }
 0x145   :  { %2993 = vtanh.bf16 %v891_v32  ;;  %v2698_v38 = vpop.f32.mrf.mxu0 }
 0x146   :  { %v491_v40 = vadd.f32 %v2698_v38, %v3435_v47 }
 0x147   :  { %v482_v41 = vpop.f32.mrf.mxu0 }
 0x148   :  { %v893_v43 = vpack.c.bf16 %v491_v40, %v488_v39  ;;  %v483_v45 = vadd.f32 %v3435_v47, %v482_v41 }
 0x149   :  { %v2701_v46 = vpop.f32.mrf.mxu0 }
 0x14a   :  { %v3499_v48 = vpop.eup %2987  ;;  %2995 = vtanh.bf16 %v893_v43  ;;  %v892_v50 = vpack.c.bf16 %v483_v45, %v480_v42  ;;  %v504_v55 = vadd.f32 %v2701_v46, %v3435_v47 }
 0x14b   :  { %v3501_v51 = vpop.eup %2989  ;;  %v495_v52 = vpop.f32.mrf.mxu0  ;;  %2831 = vmatprep.mubr.bf16.mxu1 %v3499_v48 }
 0x14c   :  { %2997 = vtanh.bf16 %v892_v50  ;;  %2832 = vmatmul.mubr.bf16.gmra.mxu1 %v3501_v51  ;;  %v496_v57 = vadd.f32 %v3435_v47, %v495_v52 }
 0x14d   :  { %v2702_v53 = vpop.f32.mrf.mxu0 }
 0x14e   :  { %v507_v54 = vadd.f32 %v2702_v53, %v3435_v47 }
 0x14f   :  { %v498_v56 = vpop.f32.mrf.mxu0 }
 0x150   :  { %v499_v58 = vadd.f32 %v3435_v47, %v498_v56  ;;  %v895_v59 = vpack.c.bf16 %v507_v54, %v504_v55 }
 0x151   :  { %v2705_v60 = vpop.f32.mrf.mxu0 }
 0x152   :  { %v2992_v61 = vpop.eup %2991  ;;  %v894_v62 = vpack.c.bf16 %v499_v58, %v496_v57  ;;  %v520_v6 = vadd.f32 %v2705_v60, %v3435_v47 }
 0x153   :  { %v2994_v0 = vpop.eup %2993  ;;  %v511_v1 = vpop.f32.mrf.mxu0  ;;  %2835 = vmatprep.mubr.bf16.mxu1 %v2992_v61 }
 0x154   :  { %2999 = vtanh.bf16 %v894_v62  ;;  %2836 = vmatmul.mubr.bf16.gmra.mxu1 %v2994_v0  ;;  %v512_v10 = vadd.f32 %v3435_v47, %v511_v1 }
 0x155   :  { %3001 = vtanh.bf16 %v895_v59  ;;  %v2706_v2 = vpop.f32.mrf.mxu0 }
 0x156   :  { %v523_v4 = vadd.f32 %v2706_v2, %v3435_v47 }
 0x157   :  { %v514_v7 = vpop.f32.mrf.mxu0 }
 0x158   :  { %v2996_v9 = vpop.eup %2995  ;;  %v515_v11 = vadd.f32 %v3435_v47, %v514_v7  ;;  %v897_v12 = vpack.c.bf16 %v523_v4, %v520_v6 }
 0x159   :  { %v2709_v13 = vpop.f32.mrf.mxu0  ;;  %2507 = vmatprep.subr.bf16.mxu0 %v2996_v9 }
 0x15a   :  { %v2998_v14 = vpop.eup %2997  ;;  %v896_v15 = vpack.c.bf16 %v515_v11, %v512_v10  ;;  %2508 = vmatpush3.bf16.xpose.msra.mxu0 %v3481_v21  ;;  %v536_v20 = vadd.f32 %v2709_v13, %v3435_v47 }
 0x15b   :  { %v527_v16 = vpop.f32.mrf.mxu0  ;;  %2839 = vmatprep.mubr.bf16.mxu1 %v2998_v14  ;;  %2509 = vmatprep.subr.bf16.mxu0 %v2998_v14 }
 0x15c   :  { %3003 = vtanh.bf16 %v896_v15  ;;  %2840 = vmatmul.mubr.bf16.gmra.mxu1 %v2996_v9  ;;  %v528_v23 = vadd.f32 %v3435_v47, %v527_v16 }
 0x15d   :  { %3005 = vtanh.bf16 %v897_v12  ;;  %v2710_v18 = vpop.f32.mrf.mxu0 }
 0x15e   :  { %v539_v19 = vadd.f32 %v2710_v18, %v3435_v47 }
 0x15f   :  { %v530_v22 = vpop.f32.mrf.mxu0 }
 0x160   :  { %v531_v24 = vadd.f32 %v3435_v47, %v530_v22  ;;  %v899_v25 = vpack.c.bf16 %v539_v19, %v536_v20 }
 0x161   :  { %v2713_v27 = vpop.f32.mrf.mxu0 }
 0x162   :  { %v3524_v28 = vpop.eup %2999  ;;  %v898_v21 = vpack.c.bf16 %v531_v24, %v528_v23  ;;  %2510 = vmatpush3.bf16.xpose.msra.mxu0 %v3479_v17  ;;  %v552_v35 = vadd.f32 %v2713_v27, %v3435_v47 }
 0x163   :  { %v3527_v29 = vpop.eup %3001  ;;  %v543_v31 = vpop.f32.mrf.mxu0  ;;  %2843 = vmatprep.mubr.bf16.mxu1 %v3524_v28  ;;  %2511 = vmatprep.subr.bf16.mxu0 %v2994_v0 }
 0x164   :  { %3007 = vtanh.bf16 %v898_v21  ;;  %2844 = vmatmul.mubr.bf16.gmra.mxu1 %v3527_v29  ;;  %v544_v38 = vadd.f32 %v3435_v47, %v543_v31 }
 0x165   :  { %3009 = vtanh.bf16 %v899_v25  ;;  %v2714_v32 = vpop.f32.mrf.mxu0 }
 0x166   :  { %v555_v33 = vadd.f32 %v2714_v32, %v3435_v47 }
 0x167   :  { %v546_v37 = vpop.f32.mrf.mxu0 }
 0x168   :  { %v547_v17 = vadd.f32 %v3435_v47, %v546_v37  ;;  %v901_v39 = vpack.c.bf16 %v555_v33, %v552_v35 }
 0x169   :  { %v2717_v40 = vpop.f32.mrf.mxu0 }
 0x16a   :  { %v3535_v41 = vpop.eup %3003  ;;  %v900_v42 = vpack.c.bf16 %v547_v17, %v544_v38  ;;  %2512 = vmatpush3.bf16.xpose.msra.mxu0 %v3471_v3  ;;  %v568_v52 = vadd.f32 %v2717_v40, %v3435_v47 }
 0x16b   :  { %v3538_v43 = vpop.eup %3005  ;;  %v559_v45 = vpop.f32.mrf.mxu0  ;;  %2847 = vmatprep.mubr.bf16.mxu1 %v3535_v41  ;;  %2513 = vmatprep.subr.bf16.mxu0 %v2992_v61 }
 0x16c   :  { %3011 = vtanh.bf16 %v900_v42  ;;  %2848 = vmatmul.mubr.bf16.gmra.mxu1 %v3538_v43  ;;  %v560_v54 = vadd.f32 %v3435_v47, %v559_v45 }
 0x16d   :  { %3013 = vtanh.bf16 %v901_v39  ;;  %v2718_v46 = vpop.f32.mrf.mxu0 }
 0x16e   :  { %v571_v50 = vadd.f32 %v2718_v46, %v3435_v47 }
 0x16f   :  { %v562_v53 = vpop.f32.mrf.mxu0 }
 0x170   :  { %v563_v3 = vadd.f32 %v3435_v47, %v562_v53  ;;  %v903_v55 = vpack.c.bf16 %v571_v50, %v568_v52 }
 0x171   :  { %v2721_v56 = vpop.f32.mrf.mxu0 }
 0x172   :  { %v3546_v57 = vpop.eup %3007  ;;  %v902_v58 = vpack.c.bf16 %v563_v3, %v560_v54  ;;  %2514 = vmatpush3.bf16.xpose.msra.mxu0 %v3469_v63  ;;  %v584_v0 = vadd.f32 %v2721_v56, %v3435_v47 }
 0x173   :  { %v3549_v59 = vpop.eup %3009  ;;  %v575_v60 = vpop.f32.mrf.mxu0  ;;  %2851 = vmatprep.mubr.bf16.mxu1 %v3546_v57  ;;  %2515 = vmatprep.subr.bf16.mxu0 %v3501_v51 }
 0x174   :  { %3015 = vtanh.bf16 %v902_v58  ;;  %2852 = vmatmul.mubr.bf16.gmra.mxu1 %v3549_v59  ;;  %v576_v2 = vadd.f32 %v3435_v47, %v575_v60 }
 0x175   :  { %3017 = vtanh.bf16 %v903_v55  ;;  %v2722_v61 = vpop.f32.mrf.mxu0 }
 0x176   :  { %v587_v62 = vadd.f32 %v2722_v61, %v3435_v47 }
 0x177   :  { %v578_v1 = vpop.f32.mrf.mxu0 }
 0x178   :  { %v579_v63 = vadd.f32 %v3435_v47, %v578_v1  ;;  %v905_v4 = vpack.c.bf16 %v587_v62, %v584_v0 }
 0x179   :  { %v2725_v5 = vpop.f32.mrf.mxu0 }
 0x17a   :  { %v3558_v6 = vpop.eup %3011  ;;  %v904_v7 = vpack.c.bf16 %v579_v63, %v576_v2  ;;  %2516 = vmatpush3.bf16.xpose.msra.mxu0 %v3461_v49  ;;  %v600_v12 = vadd.f32 %v2725_v5, %v3435_v47 }
 0x17b   :  { %v3561_v51 = vpop.eup %3013  ;;  %v591_v9 = vpop.f32.mrf.mxu0  ;;  %2855 = vmatprep.mubr.bf16.mxu1 %v3558_v6  ;;  %2517 = vmatprep.subr.bf16.mxu0 %v3499_v48 }
 0x17c   :  { %3019 = vtanh.bf16 %v904_v7  ;;  %2856 = vmatmul.mubr.bf16.gmra.mxu1 %v3561_v51  ;;  %v592_v14 = vadd.f32 %v3435_v47, %v591_v9 }
 0x17d   :  { %3021 = vtanh.bf16 %v905_v4  ;;  %v2726_v10 = vpop.f32.mrf.mxu0 }
 0x17e   :  { %v603_v11 = vadd.f32 %v2726_v10, %v3435_v47 }
 0x17f   :  { %v594_v13 = vpop.f32.mrf.mxu0 }
 0x180   :  { %v595_v49 = vadd.f32 %v3435_v47, %v594_v13  ;;  %v907_v15 = vpack.c.bf16 %v603_v11, %v600_v12 }
 0x181   :  { %v2729_v16 = vpop.f32.mrf.mxu0 }
 0x182   :  { %v3570_v18 = vpop.eup %3015  ;;  %v906_v19 = vpack.c.bf16 %v595_v49, %v592_v14  ;;  %2518 = vmatpush3.bf16.xpose.msra.mxu0 %v3459_v44  ;;  %v616_v23 = vadd.f32 %v2729_v16, %v3435_v47 }
 0x183   :  { %v3573_v48 = vpop.eup %3017  ;;  %v607_v20 = vpop.f32.mrf.mxu0  ;;  %2859 = vmatprep.mubr.bf16.mxu1 %v3570_v18  ;;  %2519 = vmatprep.subr.bf16.mxu0 %v3491_v36 }
 0x184   :  { %3023 = vtanh.bf16 %v906_v19  ;;  %2860 = vmatmul.mubr.bf16.gmra.mxu1 %v3573_v48  ;;  %v608_v27 = vadd.f32 %v3435_v47, %v607_v20 }
 0x185   :  { %3025 = vtanh.bf16 %v907_v15  ;;  %v2730_v22 = vpop.f32.mrf.mxu0 }
 0x186   :  { %v619_v24 = vadd.f32 %v2730_v22, %v3435_v47 }
 0x187   :  { %v610_v25 = vpop.f32.mrf.mxu0 }
 0x188   :  { %v909_v44 = vpack.c.bf16 %v619_v24, %v616_v23  ;;  %v611_v21 = vadd.f32 %v3435_v47, %v610_v25 }
 0x189   :  { %v2733_v31 = vpop.f32.mrf.mxu0 }
 0x18a   :  { %v3582_v32 = vpop.eup %3019  ;;  %3027 = vtanh.bf16 %v909_v44  ;;  %v908_v36 = vpack.c.bf16 %v611_v21, %v608_v27  ;;  %2520 = vmatpush3.bf16.xpose.msra.mxu0 %v3451_v30  ;;  %v632_v17 = vadd.f32 %v2733_v31, %v3435_v47 }
 0x18b   :  { %v3585_v33 = vpop.eup %3021  ;;  %v623_v35 = vpop.f32.mrf.mxu0  ;;  %2863 = vmatprep.mubr.bf16.mxu1 %v3582_v32  ;;  %2521 = vmatprep.subr.bf16.mxu0 %v3489_v34 }
 0x18c   :  { %3029 = vtanh.bf16 %v908_v36  ;;  %2864 = vmatmul.mubr.bf16.gmra.mxu1 %v3585_v33  ;;  %v624_v40 = vadd.f32 %v3435_v47, %v623_v35 }
 0x18d   :  { %v2734_v37 = vpop.f32.mrf.mxu0 }
 0x18e   :  { %v635_v38 = vadd.f32 %v2734_v37, %v3435_v47 }
 0x18f   :  { %v626_v39 = vpop.f32.mrf.mxu0 }
 0x190   :  { %v627_v30 = vadd.f32 %v3435_v47, %v626_v39  ;;  %v911_v42 = vpack.c.bf16 %v635_v38, %v632_v17 }
 0x191   :  { %v2737_v45 = vpop.f32.mrf.mxu0 }
 0x192   :  { %v3024_v46 = vpop.eup %3023  ;;  %v910_v50 = vpack.c.bf16 %v627_v30, %v624_v40  ;;  %2522 = vmatpush3.bf16.xpose.msra.mxu0 %v3449_v26  ;;  %v648_v3 = vadd.f32 %v2737_v45, %v3435_v47 }
 0x193   :  { %v3026_v34 = vpop.eup %3025  ;;  %v639_v52 = vpop.f32.mrf.mxu0  ;;  %2867 = vmatprep.mubr.bf16.mxu1 %v3024_v46 }
 0x194   :  { %3031 = vtanh.bf16 %v910_v50  ;;  %2868 = vmatmul.mubr.bf16.gmra.mxu1 %v3026_v34  ;;  %v640_v58 = vadd.f32 %v3435_v47, %v639_v52 }
 0x195   :  { %3033 = vtanh.bf16 %v911_v42  ;;  %v2738_v53 = vpop.f32.mrf.mxu0 }
 0x196   :  { %v651_v54 = vadd.f32 %v2738_v53, %v3435_v47 }
 0x197   :  { %v642_v55 = vpop.f32.mrf.mxu0 }
 0x198   :  { %v3028_v56 = vpop.eup %3027  ;;  %v643_v60 = vadd.f32 %v3435_v47, %v642_v55  ;;  %v913_v61 = vpack.c.bf16 %v651_v54, %v648_v3 }
 0x199   :  { %v2741_v62 = vpop.f32.mrf.mxu0  ;;  %2525 = vmatprep.subr.bf16.mxu1 %v3028_v56  ;;  %2524 = vmatmul.mubr.bf16.vlgmr.msra.gmra.mxu0 %v3514_v8 }
 0x19a   :  { %v3030_v26 = vpop.eup %3029  ;;  %v912_v0 = vpack.c.bf16 %v643_v60, %v640_v58  ;;  %2526 = vmatpush3.bf16.xpose.msra.mxu1 %v3561_v51  ;;  %2559 = vmatprep.mubr.bf16.mxu0 %v3514_v8  ;;  %v664_v4 = vadd.f32 %v2741_v62, %v3435_v47 }
 0x19b   :  { %v655_v1 = vpop.f32.mrf.mxu0  ;;  %2871 = vmatprep.mubr.bf16.mxu1 %v3030_v26  ;;  %2527 = vmatprep.subr.bf16.mxu1 %v3030_v26 }
 0x19c   :  { %3035 = vtanh.bf16 %v912_v0  ;;  %2872 = vmatmul.mubr.bf16.gmra.mxu1 %v3028_v56  ;;  %v656_v7 = vadd.f32 %v3435_v47, %v655_v1 }
 0x19d   :  { %3037 = vtanh.bf16 %v913_v61  ;;  %v2742_v2 = vpop.f32.mrf.mxu0 }
 0x19e   :  { %v667_v63 = vadd.f32 %v2742_v2, %v3435_v47 }
 0x19f   :  { %v658_v5 = vpop.f32.mrf.mxu0 }
 0x1a0   :  { %v659_v9 = vadd.f32 %v3435_v47, %v658_v5  ;;  %v915_v10 = vpack.c.bf16 %v667_v63, %v664_v4 }
 0x1a1   :  { %v2745_v51 = vpop.f32.mrf.mxu0 }
 0x1a2   :  { %v3606_v11 = vpop.eup %3031  ;;  %v914_v12 = vpack.c.bf16 %v659_v9, %v656_v7  ;;  %2528 = vmatpush3.bf16.xpose.msra.mxu1 %v3558_v6  ;;  %v680_v16 = vadd.f32 %v2745_v51, %v3435_v47 }
 0x1a3   :  { %v3609_v13 = vpop.eup %3033  ;;  %v671_v14 = vpop.f32.mrf.mxu0  ;;  %2875 = vmatprep.mubr.bf16.mxu1 %v3606_v11  ;;  %2529 = vmatprep.subr.bf16.mxu1 %v3026_v34 }
 0x1a4   :  { %3039 = vtanh.bf16 %v914_v12  ;;  %2876 = vmatmul.mubr.bf16.gmra.mxu1 %v3609_v13  ;;  %v672_v20 = vadd.f32 %v3435_v47, %v671_v14 }
 0x1a5   :  { %3041 = vtanh.bf16 %v915_v10  ;;  %v2746_v49 = vpop.f32.mrf.mxu0 }
 0x1a6   :  { %v683_v15 = vadd.f32 %v2746_v49, %v3435_v47 }
 0x1a7   :  { %v674_v19 = vpop.f32.mrf.mxu0 }
 0x1a8   :  { %v675_v6 = vadd.f32 %v3435_v47, %v674_v19  ;;  %v917_v22 = vpack.c.bf16 %v683_v15, %v680_v16 }
 0x1a9   :  { %v2749_v23 = vpop.f32.mrf.mxu0 }
 0x1aa   :  { %v3617_v24 = vpop.eup %3035  ;;  %v916_v25 = vpack.c.bf16 %v675_v6, %v672_v20  ;;  %2530 = vmatpush3.bf16.xpose.msra.mxu1 %v3549_v59  ;;  %v696_v36 = vadd.f32 %v2749_v23, %v3435_v47 }
 0x1ab   :  { %v3620_v27 = vpop.eup %3037  ;;  %v687_v44 = vpop.f32.mrf.mxu0  ;;  %2879 = vmatprep.mubr.bf16.mxu1 %v3617_v24  ;;  %2531 = vmatprep.subr.bf16.mxu1 %v3024_v46 }
 0x1ac   :  { %3043 = vtanh.bf16 %v916_v25  ;;  %2880 = vmatmul.mubr.bf16.gmra.mxu1 %v3620_v27  ;;  %v688_v37 = vadd.f32 %v3435_v47, %v687_v44 }
 0x1ad   :  { %3045 = vtanh.bf16 %v917_v22  ;;  %v2750_v21 = vpop.f32.mrf.mxu0 }
 0x1ae   :  { %v699_v31 = vadd.f32 %v2750_v21, %v3435_v47 }
 0x1af   :  { %v690_v35 = vpop.f32.mrf.mxu0 }
 0x1b0   :  { %v691_v59 = vadd.f32 %v3435_v47, %v690_v35  ;;  %v919_v38 = vpack.c.bf16 %v699_v31, %v696_v36 }
 0x1b1   :  { %v2753_v17 = vpop.f32.mrf.mxu0 }
 0x1b2   :  { %v3628_v39 = vpop.eup %3039  ;;  %v918_v40 = vpack.c.bf16 %v691_v59, %v688_v37  ;;  %2532 = vmatpush3.bf16.xpose.msra.mxu1 %v3546_v57  ;;  %v712_v50 = vadd.f32 %v2753_v17, %v3435_v47 }
 0x1b3   :  { %v3631_v30 = vpop.eup %3041  ;;  %v703_v42 = vpop.f32.mrf.mxu0  ;;  %2883 = vmatprep.mubr.bf16.mxu1 %v3628_v39  ;;  %2533 = vmatprep.subr.bf16.mxu1 %v3585_v33 }
 0x1b4   :  { %3047 = vtanh.bf16 %v918_v40  ;;  %2884 = vmatmul.mubr.bf16.gmra.mxu1 %v3631_v30  ;;  %v704_v52 = vadd.f32 %v3435_v47, %v703_v42 }
 0x1b5   :  { %3049 = vtanh.bf16 %v919_v38  ;;  %v2754_v45 = vpop.f32.mrf.mxu0 }
 0x1b6   :  { %v715_v46 = vadd.f32 %v2754_v45, %v3435_v47 }
 0x1b7   :  { %v706_v34 = vpop.f32.mrf.mxu0 }
 0x1b8   :  { %v707_v57 = vadd.f32 %v3435_v47, %v706_v34  ;;  %v921_v53 = vpack.c.bf16 %v715_v46, %v712_v50 }
 0x1b9   :  { %v2757_v54 = vpop.f32.mrf.mxu0 }
 0x1ba   :  { %v3640_v3 = vpop.eup %3043  ;;  %v920_v55 = vpack.c.bf16 %v707_v57, %v704_v52  ;;  %2534 = vmatpush3.bf16.xpose.msra.mxu1 %v3538_v43  ;;  %v728_v61 = vadd.f32 %v2757_v54, %v3435_v47 }
 0x1bb   :  { %v3643_v33 = vpop.eup %3045  ;;  %v719_v56 = vpop.f32.mrf.mxu0  ;;  %2887 = vmatprep.mubr.bf16.mxu1 %v3640_v3  ;;  %2535 = vmatprep.subr.bf16.mxu1 %v3582_v32 }
 0x1bc   :  { %3051 = vtanh.bf16 %v920_v55  ;;  %2888 = vmatmul.mubr.bf16.gmra.mxu1 %v3643_v33  ;;  %v720_v26 = vadd.f32 %v3435_v47, %v719_v56 }
 0x1bd   :  { %3053 = vtanh.bf16 %v921_v53  ;;  %v2758_v58 = vpop.f32.mrf.mxu0 }
 0x1be   :  { %v731_v60 = vadd.f32 %v2758_v58, %v3435_v47 }
 0x1bf   :  { %v722_v62 = vpop.f32.mrf.mxu0 }
 0x1c0   :  { %v723_v43 = vadd.f32 %v3435_v47, %v722_v62  ;;  %v923_v0 = vpack.c.bf16 %v731_v60, %v728_v61 }
 0x1c1   :  { %v2761_v1 = vpop.f32.mrf.mxu0 }
 0x1c2   :  { %v3652_v2 = vpop.eup %3047  ;;  %v922_v63 = vpack.c.bf16 %v723_v43, %v720_v26  ;;  %2536 = vmatpush3.bf16.xpose.msra.mxu1 %v3535_v41  ;;  %v744_v7 = vadd.f32 %v2761_v1, %v3435_v47 }
 0x1c3   :  { %v3655_v32 = vpop.eup %3049  ;;  %v735_v4 = vpop.f32.mrf.mxu0  ;;  %2891 = vmatprep.mubr.bf16.mxu1 %v3652_v2  ;;  %2537 = vmatprep.subr.bf16.mxu1 %v3573_v48 }
 0x1c4   :  { %3055 = vtanh.bf16 %v922_v63  ;;  %2892 = vmatmul.mubr.bf16.gmra.mxu1 %v3655_v32  ;;  %v736_v51 = vadd.f32 %v3435_v47, %v735_v4 }
 0x1c5   :  { %3057 = vtanh.bf16 %v923_v0  ;;  %v2762_v5 = vpop.f32.mrf.mxu0 }
 0x1c6   :  { %v747_v9 = vadd.f32 %v2762_v5, %v3435_v47 }
 0x1c7   :  { %v738_v10 = vpop.f32.mrf.mxu0 }
 0x1c8   :  { %v925_v41 = vpack.c.bf16 %v747_v9, %v744_v7  ;;  %v739_v12 = vadd.f32 %v3435_v47, %v738_v10 }
 0x1c9   :  { %v2765_v14 = vpop.f32.mrf.mxu0 }
 0x1ca   :  { %v3664_v49 = vpop.eup %3051  ;;  %3059 = vtanh.bf16 %v925_v41  ;;  %v924_v48 = vpack.c.bf16 %v739_v12, %v736_v51  ;;  %2538 = vmatpush3.bf16.xpose.msra.mxu1 %v3527_v29  ;;  %v760_v6 = vadd.f32 %v2765_v14, %v3435_v47 }
 0x1cb   :  { %v3667_v15 = vpop.eup %3053  ;;  %v751_v16 = vpop.f32.mrf.mxu0  ;;  %2895 = vmatprep.mubr.bf16.mxu1 %v3664_v49  ;;  %2539 = vmatprep.subr.bf16.mxu1 %v3570_v18 }
 0x1cc   :  { %3061 = vtanh.bf16 %v924_v48  ;;  %2896 = vmatmul.mubr.bf16.gmra.mxu1 %v3667_v15  ;;  %v752_v23 = vadd.f32 %v3435_v47, %v751_v16 }
 0x1cd   :  { %v2766_v19 = vpop.f32.mrf.mxu0 }
 0x1ce   :  { %v763_v20 = vadd.f32 %v2766_v19, %v3435_v47 }
 0x1cf   :  { %v754_v22 = vpop.f32.mrf.mxu0 }
 0x1d0   :  { %v755_v29 = vadd.f32 %v3435_v47, %v754_v22  ;;  %v927_v25 = vpack.c.bf16 %v763_v20, %v760_v6 }
 0x1d1   :  { %v2769_v44 = vpop.f32.mrf.mxu0 }
 0x1d2   :  { %v3676_v21 = vpop.eup %3055  ;;  %v926_v31 = vpack.c.bf16 %v755_v29, %v752_v23  ;;  %2540 = vmatpush3.bf16.xpose.msra.mxu1 %v3524_v28  ;;  %v776_v59 = vadd.f32 %v2769_v44, %v3435_v47 }
 0x1d3   :  { %v3058_v18 = vpop.eup %3057  ;;  %v767_v36 = vpop.f32.mrf.mxu0  ;;  %2899 = vmatprep.mubr.bf16.mxu1 %v3676_v21 }
 0x1d4   :  { %3063 = vtanh.bf16 %v926_v31  ;;  %2900 = vmatmul.mubr.bf16.gmra.mxu1 %v3058_v18  ;;  %v768_v40 = vadd.f32 %v3435_v47, %v767_v36 }
 0x1d5   :  { %3065 = vtanh.bf16 %v927_v25  ;;  %v2770_v35 = vpop.f32.mrf.mxu0 }
 0x1d6   :  { %v779_v37 = vadd.f32 %v2770_v35, %v3435_v47 }
 0x1d7   :  { %v770_v38 = vpop.f32.mrf.mxu0 }
 0x1d8   :  { %v3060_v17 = vpop.eup %3059  ;;  %v771_v42 = vadd.f32 %v3435_v47, %v770_v38  ;;  %v929_v45 = vpack.c.bf16 %v779_v37, %v776_v59 }
 0x1d9   :  { %v2773_v28 = vpop.f32.mrf.mxu0  ;;  %2543 = vmatprep.subr.bf16.mxu0 %v3060_v17 }
 0x1da   :  { %v3062_v46 = vpop.eup %3061  ;;  %v928_v50 = vpack.c.bf16 %v771_v42, %v768_v40  ;;  %2544 = vmatpush3.bf16.xpose.msra.mxu0 %v3643_v33  ;;  %v792_v53 = vadd.f32 %v2773_v28, %v3435_v47 }
 0x1db   :  { %v783_v34 = vpop.f32.mrf.mxu0  ;;  %2903 = vmatprep.mubr.bf16.mxu1 %v3062_v46  ;;  %2545 = vmatprep.subr.bf16.mxu0 %v3062_v46 }
 0x1dc   :  { %3067 = vtanh.bf16 %v928_v50  ;;  %2904 = vmatmul.mubr.bf16.gmra.mxu1 %v3060_v17  ;;  %v784_v55 = vadd.f32 %v3435_v47, %v783_v34 }
 0x1dd   :  { %3069 = vtanh.bf16 %v929_v45  ;;  %v2774_v52 = vpop.f32.mrf.mxu0 }
 0x1de   :  { %v795_v57 = vadd.f32 %v2774_v52, %v3435_v47 }
 0x1df   :  { %v786_v54 = vpop.f32.mrf.mxu0 }
 0x1e0   :  { %v787_v56 = vadd.f32 %v3435_v47, %v786_v54  ;;  %v931_v58 = vpack.c.bf16 %v795_v57, %v792_v53  ;;  %v3699_v47 = vld [vmem:[%s4381_s4] ss:$0 sm:$0xff] }
 0x1e1   :  { %v2777_v60 = vpop.f32.mrf.mxu0 }
 0x1e2   :  { %v3689_v61 = vpop.eup %3063  ;;  %v930_v33 = vpack.c.bf16 %v787_v56, %v784_v55  ;;  %2546 = vmatpush3.bf16.xpose.msra.mxu0 %v3640_v3  ;;  %v3704_v3 = vld [vmem:[%s4379_s2] ss:$0 sm:$0xff] }
 0x1e3   :  { %v3692_v62 = vpop.eup %3065  ;;  %v799_v26 = vpop.f32.mrf.mxu0  ;;  %2907 = vmatprep.mubr.bf16.mxu1 %v3689_v61  ;;  %2547 = vmatprep.subr.bf16.mxu0 %v3058_v18  ;;  %v808_v4 = vadd.f32 %v3704_v3, %v2777_v60 }
 0x1e4   :  { %3071 = vtanh.bf16 %v930_v33  ;;  %v2813_v43 = vpop.f32.mrf.mxu1  ;;  %2908 = vmatmul.mubr.bf16.gmra.mxu1 %v3692_v62  ;;  %v800_v7 = vadd.f32 %v3704_v3, %v799_v26 }
 0x1e5   :  { %3073 = vtanh.bf16 %v931_v58  ;;  %v2778_v0 = vpop.f32.mrf.mxu0  ;;  %v3711_v51 = vadd.f32 %v2813_v43, %v3699_v47 }
 0x1e6   :  { %v811_v1 = vadd.f32 %v3704_v3, %v2778_v0  ;;  %v1111_v63 = vpop.f32.mrf.mxu1 }
 0x1e7   :  { %v802_v5 = vpop.f32.mrf.mxu0  ;;  %v3722_v6 = vadd.f32 %v3699_v47, %v1111_v63 }
 0x1e8   :  { %v803_v9 = vadd.f32 %v3704_v3, %v802_v5  ;;  %v2814_v10 = vpop.f32.mrf.mxu1  ;;  %v933_v41 = vpack.c.bf16 %v811_v1, %v808_v4 }
 0x1e9   :  { %v3714_v12 = vadd.f32 %v2814_v10, %v3699_v47  ;;  %v2781_v14 = vpop.f32.mrf.mxu0 }
 0x1ea   :  { %v3716_v48 = vpop.eup %3067  ;;  %v932_v16 = vpack.c.bf16 %v803_v9, %v800_v7  ;;  %v1114_v19 = vpop.f32.mrf.mxu1  ;;  %2548 = vmatpush3.bf16.xpose.msra.mxu0 %v3631_v30  ;;  %v824_v36 = vadd.f32 %v3704_v3, %v2781_v14 }
 0x1eb   :  { %v3719_v20 = vpop.eup %3069  ;;  %v1623_v22 = vpack.c.bf16 %v3714_v12, %v3711_v51  ;;  %v3727_v23 = vadd.f32 %v3699_v47, %v1114_v19  ;;  %v815_v29 = vpop.f32.mrf.mxu0  ;;  %2911 = vmatprep.mubr.bf16.mxu1 %v3716_v48  ;;  %2549 = vmatprep.subr.bf16.mxu0 %v3676_v21 }
 0x1ec   :  { %3075 = vtanh.bf16 %v932_v16  ;;  %v2817_v25 = vpop.f32.mrf.mxu1  ;;  %2912 = vmatmul.mubr.bf16.gmra.mxu1 %v3719_v20  ;;  %v816_v37 = vadd.f32 %v3704_v3, %v815_v29 }
 0x1ed   :  { %3077 = vtanh.bf16 %v933_v41  ;;  %v1622_v30 = vpack.c.bf16 %v3727_v23, %v3722_v6  ;;  %v2782_v44 = vpop.f32.mrf.mxu0  ;;  %v3739_v38 = vadd.f32 %v2817_v25, %v3699_v47 }
 0x1ee   :  { %v827_v31 = vadd.f32 %v3704_v3, %v2782_v44  ;;  %v1127_v18 = vpop.f32.mrf.mxu1 }
 0x1ef   :  { %v818_v35 = vpop.f32.mrf.mxu0  ;;  %v3750_v34 = vadd.f32 %v3699_v47, %v1127_v18 }
 0x1f0   :  { %v819_v59 = vadd.f32 %v3704_v3, %v818_v35  ;;  %v2818_v21 = vpop.f32.mrf.mxu1  ;;  %v935_v17 = vpack.c.bf16 %v827_v31, %v824_v36 }
 0x1f1   :  { %v3742_v40 = vadd.f32 %v2818_v21, %v3699_v47  ;;  %v2785_v42 = vpop.f32.mrf.mxu0 }
 0x1f2   :  { %v3744_v45 = vpop.eup %3071  ;;  %v934_v28 = vpack.c.bf16 %v819_v59, %v816_v37  ;;  %v1130_v46 = vpop.f32.mrf.mxu1  ;;  %2550 = vmatpush3.bf16.xpose.msra.mxu0 %v3628_v39  ;;  %v840_v60 = vadd.f32 %v3704_v3, %v2785_v42 }
 0x1f3   :  { %v3747_v50 = vpop.eup %3073  ;;  %v1625_v52 = vpack.c.bf16 %v3742_v40, %v3739_v38  ;;  %v3755_v57 = vadd.f32 %v3699_v47, %v1130_v46  ;;  %v831_v53 = vpop.f32.mrf.mxu0  ;;  %2915 = vmatprep.mubr.bf16.mxu1 %v3744_v45  ;;  %2551 = vmatprep.subr.bf16.mxu0 %v3667_v15 }
 0x1f4   :  { %3079 = vtanh.bf16 %v934_v28  ;;  %v3759_v54 = vpop.f32.mrf.mxu1  ;;  %2916 = vmatmul.mubr.bf16.gmra.mxu1 %v3747_v50  ;;  %v832_v26 = vadd.f32 %v3704_v3, %v831_v53 }
 0x1f5   :  { %3081 = vtanh.bf16 %v935_v17  ;;  %v1624_v39 = vpack.c.bf16 %v3755_v57, %v3750_v34  ;;  %v2786_v55 = vpop.f32.mrf.mxu0 }
 0x1f6   :  { %v843_v56 = vadd.f32 %v3704_v3, %v2786_v55  ;;  %v3765_v58 = vpop.f32.mrf.mxu1 }
 0x1f7   :  { %v834_v33 = vpop.f32.mrf.mxu0 }
 0x1f8   :  { %v835_v15 = vadd.f32 %v3704_v3, %v834_v33  ;;  %v3770_v43 = vpop.f32.mrf.mxu1  ;;  %v937_v0 = vpack.c.bf16 %v843_v56, %v840_v60 }
 0x1f9   :  { %v2789_v1 = vpop.f32.mrf.mxu0 }
 0x1fa   :  { %v3772_v63 = vpop.eup %3075  ;;  %v936_v4 = vpack.c.bf16 %v835_v15, %v832_v26  ;;  %v3774_v5 = vpop.f32.mrf.mxu1  ;;  %2552 = vmatpush3.bf16.xpose.msra.mxu0 %v3620_v27  ;;  %v856_v27 = vadd.f32 %v3704_v3, %v2789_v1 }
 0x1fb   :  { %v3777_v7 = vpop.eup %3077  ;;  %v847_v9 = vpop.f32.mrf.mxu0  ;;  %2919 = vmatprep.mubr.bf16.mxu1 %v3772_v63  ;;  %2553 = vmatprep.subr.bf16.mxu0 %v3664_v49 }
 0x1fc   :  { %3083 = vtanh.bf16 %v936_v4  ;;  %v3781_v10 = vpop.f32.mrf.mxu1  ;;  %2920 = vmatmul.mubr.bf16.gmra.mxu1 %v3777_v7  ;;  %v848_v29 = vadd.f32 %v3704_v3, %v847_v9 }
 0x1fd   :  { %3085 = vtanh.bf16 %v937_v0  ;;  %v2790_v41 = vpop.f32.mrf.mxu0 }
 0x1fe   :  { %v859_v14 = vadd.f32 %v3704_v3, %v2790_v41  ;;  %v3785_v16 = vpop.f32.mrf.mxu1 }
 0x1ff   :  { %v850_v19 = vpop.f32.mrf.mxu0 }
 0x200   :  { %v851_v25 = vadd.f32 %v3704_v3, %v850_v19  ;;  %v2826_v44 = vpop.f32.mrf.mxu1  ;;  %v939_v49 = vpack.c.bf16 %v859_v14, %v856_v27 }
 0x201   :  { %v2793_v31 = vpop.f32.mrf.mxu0 }
 0x202   :  { %v3790_v18 = vpop.eup %3079  ;;  %v938_v36 = vpack.c.bf16 %v851_v25, %v848_v29  ;;  %v3792_v35 = vpop.f32.mrf.mxu1  ;;  %2554 = vmatpush3.bf16.xpose.msra.mxu0 %v3617_v24  ;;  %v872_v42 = vadd.f32 %v3704_v3, %v2793_v31 }
 0x203   :  { %v3795_v37 = vpop.eup %3081  ;;  %v863_v59 = vpop.f32.mrf.mxu0  ;;  %2923 = vmatprep.mubr.bf16.mxu1 %v3790_v18  ;;  %2555 = vmatprep.subr.bf16.mxu0 %v3655_v32 }
 0x204   :  { %3087 = vtanh.bf16 %v938_v36  ;;  %v2829_v21 = vpop.f32.mrf.mxu1  ;;  %2924 = vmatmul.mubr.bf16.gmra.mxu1 %v3795_v37  ;;  %v864_v24 = vadd.f32 %v3704_v3, %v863_v59 }
 0x205   :  { %3089 = vtanh.bf16 %v939_v49  ;;  %v2794_v17 = vpop.f32.mrf.mxu0  ;;  %v3805_v32 = vadd.f32 %v2829_v21, %v3699_v47 }
 0x206   :  { %v875_v28 = vadd.f32 %v3704_v3, %v2794_v17  ;;  %v1175_v46 = vpop.f32.mrf.mxu1 }
 0x207   :  { %v866_v53 = vpop.f32.mrf.mxu0  ;;  %v3816_v4 = vadd.f32 %v3699_v47, %v1175_v46 }
 0x208   :  { %v941_v55 = vpack.c.bf16 %v875_v28, %v872_v42  ;;  %v867_v56 = vadd.f32 %v3704_v3, %v866_v53  ;;  %v2830_v60 = vpop.f32.mrf.mxu1  ;;  %v1168_v28 = vadd.f32 %v3781_v10, %v3699_v47  ;;  %v1163_v10 = vadd.f32 %v3699_v47, %v3792_v35 }
 0x209   :  { %v3808_v33 = vadd.f32 %v2830_v60, %v3699_v47 }
 0x20a   :  { %v3810_v26 = vpop.eup %3083  ;;  %3091 = vtanh.bf16 %v941_v55  ;;  %v940_v15 = vpack.c.bf16 %v867_v56, %v864_v24  ;;  %v1178_v0 = vpop.f32.mrf.mxu1  ;;  %2556 = vmatpush3.bf16.xpose.msra.mxu0 %v3609_v13 }
 0x20b   :  { %v3813_v1 = vpop.eup %3085  ;;  %v1631_v3 = vpack.c.bf16 %v3808_v33, %v3805_v32  ;;  %v3821_v9 = vadd.f32 %v3699_v47, %v1178_v0  ;;  %2927 = vmatprep.mubr.bf16.mxu1 %v3810_v26  ;;  %2557 = vmatprep.subr.bf16.mxu0 %v3652_v2 }
 0x20c   :  { %3093 = vtanh.bf16 %v940_v15  ;;  %v3825_v41 = vpop.f32.mrf.mxu1  ;;  %2928 = vmatmul.mubr.bf16.gmra.mxu1 %v3813_v1 }
 0x20d   :  { %v1630_v13 = vpack.c.bf16 %v3821_v9, %v3816_v4 }
 0x20e   :  { %v3830_v14 = vpop.f32.mrf.mxu1 }
 0x210   :  { %v3832_v27 = vpop.f32.mrf.mxu1 }
 0x212   :  { %v3834_v19 = vpop.eup %3087  ;;  %v3836_v29 = vpop.f32.mrf.mxu1  ;;  %2558 = vmatpush3.bf16.xpose.msra.mxu0 %v3606_v11  ;;  %v1171_v11 = vadd.f32 %v2826_v44, %v3699_v47 }
 0x213   :  { %v3090_v25 = vpop.eup %3089  ;;  %2931 = vmatprep.mubr.bf16.mxu1 %v3834_v19 }
 0x214   :  { %v2837_v2 = vpop.f32.mrf.mxu1  ;;  %2932 = vmatmul.mubr.bf16.gmra.mxu1 %v3090_v25  ;;  %v1629_v55 = vpack.c.bf16 %v1171_v11, %v1168_v28 }
 0x216   :  { %v1207_v49 = vpop.f32.mrf.mxu1 }
 0x218   :  { %v3092_v31 = vpop.eup %3091  ;;  %v2838_v36 = vpop.f32.mrf.mxu1 }
 0x219   :  { %2561 = vmatprep.subr.bf16.mxu1 %v3092_v31  ;;  %2560 = vmatmul.mubr.bf16.vlgmr.msra.gmra.mxu0 %v3514_v8  ;;  %v1219_v11 = vadd.f32 %v2838_v36, %v3699_v47 }
 0x21a   :  { %v3094_v59 = vpop.eup %3093  ;;  %v1210_v21 = vpop.f32.mrf.mxu1  ;;  %2595 = vmatprep.mubr.bf16.mxu0 %v3514_v8 }
 0x21b   :  { %2935 = vmatprep.mubr.bf16.mxu1 %v3094_v59 }
 0x21c   :  { %v2841_v17 = vpop.f32.mrf.mxu1  ;;  %2936 = vmatmul.mubr.bf16.gmra.mxu1 %v3092_v31 }
 0x21d   :  { %2541 = vmatprep.mubr.bf16.mxu1 %v3514_v8  ;;  %v1232_v53 = vadd.f32 %v2841_v17, %v3699_v47 }
 0x21e   :  { %v1223_v42 = vpop.f32.mrf.mxu1 }
 0x21f   :  { %v1224_v60 = vadd.f32 %v3699_v47, %v1223_v42  ;;  %v1160_v42 = vadd.f32 %v3699_v47, %v3785_v16 }
 0x220   :  { %v2842_v46 = vpop.f32.mrf.mxu1 }
 0x221   :  { %v1235_v24 = vadd.f32 %v2842_v46, %v3699_v47  ;;  %v1216_v46 = vadd.f32 %v2837_v2, %v3699_v47 }
 0x222   :  { %v1226_v56 = vpop.f32.mrf.mxu1 }
 0x223   :  { %v1637_v15 = vpack.c.bf16 %v1235_v24, %v1232_v53  ;;  %v1227_v0 = vadd.f32 %v3699_v47, %v1226_v56  ;;  %v1628_v24 = vpack.c.bf16 %v1163_v10, %v1160_v42  ;;  %v1635_v35 = vpack.c.bf16 %v1219_v11, %v1216_v46 }
 0x224   :  { %v2845_v31 = vpop.f32.mrf.mxu1  ;;  %2542 = vmatmul.mubr.bf16.vlgmr.msra.gmra.mxu1 %v3514_v8  ;;  %v1208_v10 = vadd.f32 %v3699_v47, %v1207_v49 }
 0x225   :  { %3095 = vtanh.bf16 %v1637_v15  ;;  %v1636_v44 = vpack.c.bf16 %v1227_v0, %v1224_v60  ;;  %2562 = vmatpush3.bf16.xpose.msra.mxu1 %v3777_v7  ;;  %2577 = vmatprep.mubr.bf16.mxu1 %v3514_v8  ;;  %v3860_v53 = vadd.f32 %v2845_v31, %v3699_v47  ;;  %v1155_v60 = vadd.f32 %v3770_v43, %v3699_v47 }
 0x226   :  { %3097 = vtanh.bf16 %v1629_v55  ;;  %v1239_v17 = vpop.f32.mrf.mxu1  ;;  %2563 = vmatprep.subr.bf16.mxu1 %v3094_v59  ;;  %v1211_v0 = vadd.f32 %v3699_v47, %v1210_v21  ;;  %v1152_v31 = vadd.f32 %v3759_v54, %v3699_v47 }
 0x227   :  { %3099 = vtanh.bf16 %v1636_v44  ;;  %v3866_v59 = vadd.f32 %v3699_v47, %v1239_v17 }
 0x228   :  { %v2846_v28 = vpop.f32.mrf.mxu1  ;;  %3101 = vtanh.bf16 %v1628_v24  ;;  %v1627_v11 = vpack.c.bf16 %v1155_v60, %v1152_v31  ;;  %v1203_v60 = vadd.f32 %v3832_v27, %v3699_v47 }
 0x229   :  { %v3863_v7 = vadd.f32 %v2846_v28, %v3699_v47  ;;  %3103 = vtanh.bf16 %v1635_v35  ;;  %v1634_v28 = vpack.c.bf16 %v1211_v0, %v1208_v10  ;;  %v1147_v35 = vadd.f32 %v3699_v47, %v3774_v5 }
 0x22a   :  { %v1242_v55 = vpop.f32.mrf.mxu1  ;;  %3105 = vtanh.bf16 %v1627_v11 }
 0x22b   :  { %v1639_v36 = vpack.c.bf16 %v3863_v7, %v3860_v53  ;;  %v3871_v16 = vadd.f32 %v3699_v47, %v1242_v55  ;;  %3107 = vtanh.bf16 %v1634_v28 }
 0x22c   :  { %v2849_v56 = vpop.f32.mrf.mxu1 }
 0x22d   :  { %v1638_v2 = vpack.c.bf16 %v3871_v16, %v3866_v59  ;;  %2564 = vmatpush3.bf16.xpose.msra.mxu1 %v3772_v63  ;;  %v3883_v17 = vadd.f32 %v2849_v56, %v3699_v47 }
 0x22e   :  { %v1255_v15 = vpop.f32.mrf.mxu1  ;;  %2565 = vmatprep.subr.bf16.mxu1 %v3090_v25 }
 0x22f   :  { %v3889_v25 = vadd.f32 %v3699_v47, %v1255_v15  ;;  %v1144_v15 = vadd.f32 %v3699_v47, %v3765_v58 }
 0x230   :  { %v2850_v44 = vpop.f32.mrf.mxu1 }
 0x231   :  { %v3886_v63 = vadd.f32 %v2850_v44, %v3699_v47  ;;  %v1626_v31 = vpack.c.bf16 %v1147_v35, %v1144_v15 }
 0x232   :  { %v1258_v43 = vpop.f32.mrf.mxu1 }
 0x233   :  { %v3096_v42 = vpop.eup %3095  ;;  %v1641_v21 = vpack.c.bf16 %v3886_v63, %v3883_v17  ;;  %v3894_v54 = vadd.f32 %v3699_v47, %v1258_v43  ;;  %3109 = vtanh.bf16 %v1626_v31  ;;  %v1192_v43 = vadd.f32 %v3699_v47, %v3830_v14 }
 0x234   :  { %v3098_v49 = vpop.eup %3097  ;;  %v3896_v46 = vpop.f32.mrf.mxu1  ;;  %2579 = vmatprep.subr.bf16.mxu0 %v3096_v42 }
 0x235   :  { %v3100_v24 = vpop.eup %3099  ;;  %v1640_v55 = vpack.c.bf16 %v3894_v54, %v3889_v25  ;;  %2566 = vmatpush3.bf16.xpose.msra.mxu1 %v3747_v50  ;;  %2580 = vmatpush3.bf16.xpose.msra.mxu0 %v3098_v49  ;;  %v1200_v50 = vadd.f32 %v3825_v41, %v3699_v47  ;;  %v1195_v41 = vadd.f32 %v3699_v47, %v3836_v29 }
 0x236   :  { %2567 = vmatprep.subr.bf16.mxu1 %v3834_v19  ;;  %v3904_v56 = vpop.f32.mrf.mxu1  ;;  %2581 = vmatprep.subr.bf16.mxu0 %v3100_v24  ;;  %v3102_v19 = vpop.eup %3101 }
 0x237   :  { %v1633_v5 = vpack.c.bf16 %v1203_v60, %v1200_v50  ;;  %v3104_v11 = vpop.eup %3103  ;;  %v1632_v28 = vpack.c.bf16 %v1195_v41, %v1192_v43 }
 0x238   :  { %v3910_v0 = vpop.f32.mrf.mxu1  ;;  %v3106_v49 = vpop.eup %3105 }
 0x239   :  { %3111 = vtanh.bf16 %v1633_v5  ;;  %v3108_v24 = vpop.eup %3107 }
 0x23a   :  { %v3914_v44 = vpop.f32.mrf.mxu1  ;;  %3113 = vtanh.bf16 %v1625_v52 }
 0x23b   :  { %3115 = vtanh.bf16 %v1632_v28 }
 0x23c   :  { %v3916_v10 = vpop.f32.mrf.mxu1  ;;  %3117 = vtanh.bf16 %v1624_v39 }
 0x23d   :  { %2568 = vmatpush3.bf16.xpose.msra.mxu1 %v3744_v45  ;;  %2582 = vmatpush3.bf16.xpose.msra.mxu0 %v3102_v19  ;;  %3119 = vtanh.bf16 %v1631_v3  ;;  %v1296_v12 = vadd.f32 %v3916_v10, %v3699_v47 }
 0x23e   :  { %2569 = vmatprep.subr.bf16.mxu1 %v3813_v1  ;;  %v3920_v58 = vpop.f32.mrf.mxu1  ;;  %2583 = vmatprep.subr.bf16.mxu0 %v3104_v11  ;;  %3121 = vtanh.bf16 %v1623_v22 }
 0x23f   :  { %3123 = vtanh.bf16 %v1630_v13 }
 0x240   :  { %v2858_v27 = vpop.f32.mrf.mxu1  ;;  %3125 = vtanh.bf16 %v1622_v30 }
 0x241   :  { %v3110_v52 = vpop.eup %3109 }
 0x242   :  { %v3926_v42 = vpop.f32.mrf.mxu1 }
 0x243   :  { %v1291_v10 = vadd.f32 %v3699_v47, %v3926_v42 }
 0x244   :  { %v2861_v45 = vpop.f32.mrf.mxu1 }
 0x245   :  { %2570 = vmatpush3.bf16.xpose.msra.mxu1 %v3719_v20  ;;  %2584 = vmatpush3.bf16.xpose.msra.mxu0 %v3106_v49  ;;  %v3934_v14 = vadd.f32 %v2861_v45, %v3699_v47  ;;  %v1288_v45 = vadd.f32 %v3699_v47, %v3920_v58 }
 0x246   :  { %2571 = vmatprep.subr.bf16.mxu1 %v3810_v26  ;;  %v1303_v1 = vpop.f32.mrf.mxu1  ;;  %2585 = vmatprep.subr.bf16.mxu0 %v3108_v24 }
 0x247   :  { %v3940_v20 = vadd.f32 %v3699_v47, %v1303_v1  ;;  %v3112_v15 = vpop.eup %3111 }
 0x248   :  { %v2862_v29 = vpop.f32.mrf.mxu1  ;;  %v3114_v11 = vpop.eup %3113 }
 0x249   :  { %v3937_v35 = vadd.f32 %v2862_v29, %v3699_v47  ;;  %v3116_v41 = vpop.eup %3115 }
 0x24a   :  { %v1306_v60 = vpop.f32.mrf.mxu1 }
 0x24b   :  { %v1647_v38 = vpack.c.bf16 %v3937_v35, %v3934_v14  ;;  %v3945_v40 = vadd.f32 %v3699_v47, %v1306_v60 }
 0x24c   :  { %v3947_v26 = vpop.f32.mrf.mxu1 }
 0x24d   :  { %v1646_v50 = vpack.c.bf16 %v3945_v40, %v3940_v20  ;;  %2572 = vmatpush3.bf16.xpose.msra.mxu1 %v3716_v48  ;;  %2586 = vmatpush3.bf16.xpose.msra.mxu0 %v3110_v52  ;;  %v1644_v52 = vpack.c.bf16 %v1291_v10, %v1288_v45  ;;  %v1328_v45 = vadd.f32 %v3947_v26, %v3699_v47 }
 0x24e   :  { %2573 = vmatprep.subr.bf16.mxu1 %v3795_v37  ;;  %v3956_v31 = vpop.f32.mrf.mxu1  ;;  %2587 = vmatprep.subr.bf16.mxu0 %v3112_v15  ;;  %v3118_v37 = vpop.eup %3117 }
 0x24f   :  { %v3120_v33 = vpop.eup %3119  ;;  %v1320_v26 = vadd.f32 %v3699_v47, %v3956_v31 }
 0x250   :  { %v3961_v5 = vpop.f32.mrf.mxu1  ;;  %v3122_v23 = vpop.eup %3121 }
 0x251   :  { %v1331_v10 = vadd.f32 %v3961_v5, %v3699_v47 }
 0x252   :  { %v3963_v19 = vpop.f32.mrf.mxu1 }
 0x254   :  { %v2869_v48 = vpop.f32.mrf.mxu1 }
 0x255   :  { %2574 = vmatpush3.bf16.xpose.msra.mxu1 %v3692_v62  ;;  %2588 = vmatpush3.bf16.xpose.msra.mxu0 %v3114_v11  ;;  %v1299_v62 = vadd.f32 %v2858_v27, %v3699_v47  ;;  %v3124_v27 = vpop.eup %3123  ;;  %v1344_v1 = vadd.f32 %v2869_v48, %v3699_v47 }
 0x256   :  { %2575 = vmatprep.subr.bf16.mxu1 %v3790_v18  ;;  %v1335_v34 = vpop.f32.mrf.mxu1  ;;  %2589 = vmatprep.subr.bf16.mxu0 %v3116_v41 }
 0x257   :  { %v1645_v3 = vpack.c.bf16 %v1299_v62, %v1296_v12 }
 0x258   :  { %v2870_v57 = vpop.f32.mrf.mxu1 }
 0x259   :  { %v1347_v49 = vadd.f32 %v2870_v57, %v3699_v47  ;;  %v3126_v57 = vpop.eup %3125 }
 0x25a   :  { %v1338_v39 = vpop.f32.mrf.mxu1 }
 0x25b   :  { %v1651_v42 = vpack.c.bf16 %v1347_v49, %v1344_v1  ;;  %v1339_v62 = vadd.f32 %v3699_v47, %v1338_v39 }
 0x25c   :  { %v2873_v32 = vpop.f32.mrf.mxu1 }
 0x25d   :  { %2576 = vmatpush3.bf16.xpose.msra.mxu1 %v3689_v61  ;;  %2590 = vmatpush3.bf16.xpose.msra.mxu0 %v3118_v37  ;;  %v1360_v18 = vadd.f32 %v2873_v32, %v3699_v47  ;;  %v1283_v32 = vadd.f32 %v3910_v0, %v3699_v47 }
 0x25e   :  { %v1351_v51 = vpop.f32.mrf.mxu1  ;;  %2591 = vmatprep.subr.bf16.mxu0 %v3120_v33 }
 0x25f   :  { %v1352_v61 = vadd.f32 %v3699_v47, %v1351_v51  ;;  %v1280_v51 = vadd.f32 %v3896_v46, %v3699_v47 }
 0x260   :  { %v2874_v22 = vpop.f32.mrf.mxu1 }
 0x261   :  { %v1363_v4 = vadd.f32 %v2874_v22, %v3699_v47  ;;  %v1336_v22 = vadd.f32 %v3699_v47, %v1335_v34 }
 0x262   :  { %v1354_v9 = vpop.f32.mrf.mxu1 }
 0x263   :  { %v1653_v13 = vpack.c.bf16 %v1363_v4, %v1360_v18  ;;  %v1355_v6 = vadd.f32 %v3699_v47, %v1354_v9 }
 0x264   :  { %v2877_v30 = vpop.f32.mrf.mxu1  ;;  %2578 = vmatmul.mubr.bf16.vlgmr.msra.gmra.mxu1 %v3514_v8 }
 0x265   :  { %3127 = vtanh.bf16 %v1653_v13  ;;  %v1652_v43 = vpack.c.bf16 %v1355_v6, %v1352_v61  ;;  %2592 = vmatpush3.bf16.xpose.msra.mxu0 %v3122_v23  ;;  %2613 = vmatprep.mubr.bf16.mxu1 %v3514_v8  ;;  %v3993_v29 = vadd.f32 %v2877_v30, %v3699_v47  ;;  %v1650_v61 = vpack.c.bf16 %v1339_v62, %v1336_v22 }
 0x266   :  { %3129 = vtanh.bf16 %v1645_v3  ;;  %v1367_v28 = vpop.f32.mrf.mxu1  ;;  %2593 = vmatprep.subr.bf16.mxu0 %v3124_v27  ;;  %v1643_v3 = vpack.c.bf16 %v1283_v32, %v1280_v51  ;;  %v1275_v27 = vadd.f32 %v3699_v47, %v3914_v44 }
 0x267   :  { %3131 = vtanh.bf16 %v1652_v43  ;;  %v3999_v11 = vadd.f32 %v3699_v47, %v1367_v28  ;;  %v1272_v28 = vadd.f32 %v3699_v47, %v3904_v56  ;;  %v1323_v56 = vadd.f32 %v3699_v47, %v3963_v19 }
 0x268   :  { %v2878_v24 = vpop.f32.mrf.mxu1  ;;  %3133 = vtanh.bf16 %v1644_v52  ;;  %v1649_v52 = vpack.c.bf16 %v1331_v10, %v1328_v45  ;;  %v4087_v10 = vstv %s4383_s6 }
 0x269   :  { %v3996_v60 = vadd.f32 %v2878_v24, %v3699_v47  ;;  %3135 = vtanh.bf16 %v1651_v42  ;;  %v1642_v24 = vpack.c.bf16 %v1275_v27, %v1272_v28  ;;  %v1648_v32 = vpack.c.bf16 %v1323_v56, %v1320_v26 }
 0x26a   :  { %v1370_v15 = vpop.f32.mrf.mxu1  ;;  %3137 = vtanh.bf16 %v1643_v3 }
 0x26b   :  { %v1655_v41 = vpack.c.bf16 %v3996_v60, %v3993_v29  ;;  %v4004_v58 = vadd.f32 %v3699_v47, %v1370_v15  ;;  %3139 = vtanh.bf16 %v1650_v61  ;;  %v1788_v61 = vpop.f32.mrf.mxu0 }
 0x26c   :  { %v2881_v48 = vpop.f32.mrf.mxu1  ;;  %3141 = vtanh.bf16 %v1642_v24  ;;  %v4093_v45 = vadd.f32 %v1788_v61, %v4087_v10 }
 0x26d   :  { %v1654_v37 = vpack.c.bf16 %v4004_v58, %v3999_v11  ;;  %2594 = vmatpush3.bf16.xpose.msra.mxu0 %v3126_v57  ;;  %v4015_v18 = vadd.f32 %v2881_v48, %v3699_v47  ;;  %3143 = vtanh.bf16 %v1649_v52  ;;  %v1790_v28 = vpop.f32.mrf.mxu0 }
 0x26e   :  { %v1383_v33 = vpop.f32.mrf.mxu1  ;;  %3145 = vtanh.bf16 %v1641_v21  ;;  %v4096_v24 = vadd.f32 %v1790_v28, %v4087_v10 }
 0x26f   :  { %v4021_v13 = vadd.f32 %v3699_v47, %v1383_v33  ;;  %3147 = vtanh.bf16 %v1648_v32  ;;  %v1792_v54 = vpop.f32.mrf.mxu0 }
 0x270   :  { %v2882_v12 = vpop.f32.mrf.mxu1  ;;  %3149 = vtanh.bf16 %v1640_v55  ;;  %v2082_v55 = vsub.f32 0.0, %v4093_v45  ;;  %v2083_v52 = vsub.f32 0.0, %v4096_v24 }
 0x271   :  { %v4018_v4 = vadd.f32 %v2882_v12, %v3699_v47  ;;  %3151 = vtanh.bf16 %v1647_v38 }
 0x272   :  { %v1386_v9 = vpop.f32.mrf.mxu1  ;;  %v2098_v14 = vand.u32 2147483647, %v2082_v55  ;;  %v2099_v35 = vand.u32 2147483647, %v2083_v52  ;;  %3153 = vtanh.bf16 %v1639_v36 }
 0x273   :  { %v3128_v0 = vpop.eup %3127  ;;  %v1657_v39 = vpack.c.bf16 %v4018_v4, %v4015_v18  ;;  %v4026_v46 = vadd.f32 %v3699_v47, %v1386_v9  ;;  %3155 = vtanh.bf16 %v1646_v50 }
 0x274   :  { %v3130_v34 = vpop.eup %3129  ;;  %v4028_v6 = vpop.f32.mrf.mxu1  ;;  %2597 = vmatprep.subr.bf16.mxu1 %v3128_v0  ;;  %2596 = vmatmul.mubr.bf16.vlgmr.msra.gmra.mxu0 %v3514_v8  ;;  %v2106_v32 = vsub.f32 0.0, %v2098_v14 }
 0x275   :  { %v3132_v23 = vpop.eup %3131  ;;  %v1656_v30 = vpack.c.bf16 %v4026_v46, %v4021_v13  ;;  %2598 = vmatpush3.bf16.xpose.msra.mxu1 %v3130_v34  ;;  %2631 = vmatprep.mubr.bf16.mxu0 %v3514_v8 }
 0x276   :  { %v4036_v43 = vpop.f32.mrf.mxu1  ;;  %2599 = vmatprep.subr.bf16.mxu1 %v3132_v23  ;;  %v3134_v44 = vpop.eup %3133 }
 0x277   :  { %v3136_v42 = vpop.eup %3135 }
 0x278   :  { %v4042_v49 = vpop.f32.mrf.mxu1  ;;  %v3138_v33 = vpop.eup %3137 }
 0x279   :  { %v3140_v51 = vpop.eup %3139 }
 0x27a   :  { %v4046_v1 = vpop.f32.mrf.mxu1  ;;  %v3142_v63 = vpop.eup %3141 }
 0x27b   :  { %v3144_v34 = vpop.eup %3143 }
 0x27c   :  { %v4048_v15 = vpop.f32.mrf.mxu1  ;;  %v3146_v38 = vpop.eup %3145 }
 0x27d   :  { %2600 = vmatpush3.bf16.xpose.msra.mxu1 %v3134_v44  ;;  %v3148_v26 = vpop.eup %3147  ;;  %v1424_v36 = vadd.f32 %v4048_v15, %v3699_v47 }
 0x27e   :  { %v4050_v5 = vpop.f32.mrf.mxu1  ;;  %2601 = vmatprep.subr.bf16.mxu1 %v3136_v42  ;;  %v1793_v42 = vpop.f32.mrf.mxu0 }
 0x280   :  { %v2890_v57 = vpop.f32.mrf.mxu1 }
 0x281   :  { %v1427_v53 = vadd.f32 %v2890_v57, %v3699_v47 }
 0x282   :  { %v4056_v48 = vpop.f32.mrf.mxu1 }
 0x283   :  { %v1661_v28 = vpack.c.bf16 %v1427_v53, %v1424_v36  ;;  %v1419_v15 = vadd.f32 %v3699_v47, %v4056_v48 }
 0x284   :  { %v2893_v62 = vpop.f32.mrf.mxu1 }
 0x285   :  { %2602 = vmatpush3.bf16.xpose.msra.mxu1 %v3138_v33  ;;  %v4062_v19 = vadd.f32 %v2893_v62, %v3699_v47  ;;  %v2107_v62 = vsub.f32 0.0, %v2099_v35 }
 0x286   :  { %v1431_v12 = vpop.f32.mrf.mxu1  ;;  %2603 = vmatprep.subr.bf16.mxu1 %v3140_v51  ;;  %v2114_v51 = vmul.f32 1.442695, %v2106_v32 }
 0x287   :  { %v4068_v9 = vadd.f32 %v3699_v47, %v1431_v12 }
 0x288   :  { %v2894_v22 = vpop.f32.mrf.mxu1  ;;  %3157 = vpow2.f32 %v2114_v51 }
 0x289   :  { %v4065_v31 = vadd.f32 %v2894_v22, %v3699_v47  ;;  %v2116_v22 = vmul.f32 1.442695, %v2107_v62 }
 0x28a   :  { %v1434_v3 = vpop.f32.mrf.mxu1 }
 0x28b   :  { %v1663_v0 = vpack.c.bf16 %v4065_v31, %v4062_v19  ;;  %v4073_v17 = vadd.f32 %v3699_v47, %v1434_v3  ;;  %3159 = vpow2.f32 %v2116_v22  ;;  %v1416_v22 = vadd.f32 %v3699_v47, %v4050_v5 }
 0x28c   :  { %v4075_v21 = vpop.f32.mrf.mxu1  ;;  %3161 = vtanh.bf16 %v1638_v2 }
 0x28d   :  { %v1662_v23 = vpack.c.bf16 %v4073_v17, %v4068_v9  ;;  %2604 = vmatpush3.bf16.xpose.msra.mxu1 %v3142_v63  ;;  %v3150_v63 = vpop.eup %3149  ;;  %v1660_v48 = vpack.c.bf16 %v1419_v15, %v1416_v22 }
 0x28e   :  { %v4082_v27 = vpop.f32.mrf.mxu1  ;;  %2605 = vmatprep.subr.bf16.mxu1 %v3144_v34  ;;  %v3152_v34 = vpop.eup %3151 }
 0x28f   :  { %v3154_v16 = vpop.eup %3153 }
 0x290   :  { %v4098_v25 = vpop.f32.mrf.mxu1  ;;  %v3156_v57 = vpop.eup %3155 }
 0x292   :  { %v4102_v44 = vpop.f32.mrf.mxu1 }
 0x294   :  { %v2901_v56 = vpop.f32.mrf.mxu1 }
 0x295   :  { %2606 = vmatpush3.bf16.xpose.msra.mxu1 %v3146_v38  ;;  %v3158_v38 = vpop.eup %3157 }
 0x296   :  { %v4111_v33 = vpop.f32.mrf.mxu1  ;;  %2607 = vmatprep.subr.bf16.mxu1 %v3148_v26  ;;  %v2130_v51 = vadd.f32 1.0, %v3158_v38 }
 0x298   :  { %v2902_v12 = vpop.f32.mrf.mxu1  ;;  %v3160_v32 = vpop.eup %3159 }
 0x299   :  { %v1475_v62 = vadd.f32 %v2902_v12, %v3699_v47 }
 0x29a   :  { %v1466_v3 = vpop.f32.mrf.mxu1 }
 0x29c   :  { %v2905_v61 = vpop.f32.mrf.mxu1 }
 0x29d   :  { %2608 = vmatpush3.bf16.xpose.msra.mxu1 %v3150_v63  ;;  %v1488_v40 = vadd.f32 %v2905_v61, %v3699_v47  ;;  %v2131_v61 = vadd.f32 1.0, %v3160_v32 }
 0x29e   :  { %v1479_v7 = vpop.f32.mrf.mxu1  ;;  %2609 = vmatprep.subr.bf16.mxu1 %v3152_v34  ;;  %v1472_v34 = vadd.f32 %v2901_v56, %v3699_v47  ;;  %v3162_v56 = vpop.eup %3161 }
 0x29f   :  { %v1480_v42 = vadd.f32 %v3699_v47, %v1479_v7 }
 0x2a0   :  { %v2906_v20 = vpop.f32.mrf.mxu1  ;;  %v1667_v12 = vpack.c.bf16 %v1475_v62, %v1472_v34  ;;  %v1403_v34 = vadd.f32 %v3699_v47, %v4046_v1 }
 0x2a1   :  { %v1491_v50 = vadd.f32 %v2906_v20, %v3699_v47 }
 0x2a2   :  { %v1482_v54 = vpop.f32.mrf.mxu1 }
 0x2a3   :  { %v1669_v14 = vpack.c.bf16 %v1491_v50, %v1488_v40  ;;  %v1483_v59 = vadd.f32 %v3699_v47, %v1482_v54  ;;  %v1411_v54 = vadd.f32 %v4042_v49, %v3699_v47 }
 0x2a4   :  { %v2909_v2 = vpop.f32.mrf.mxu1 }
 0x2a5   :  { %3163 = vtanh.bf16 %v1669_v14  ;;  %v1668_v35 = vpack.c.bf16 %v1483_v59, %v1480_v42  ;;  %2610 = vmatpush3.bf16.xpose.msra.mxu1 %v3154_v16  ;;  %v4133_v53 = vadd.f32 %v2909_v2, %v3699_v47  ;;  %v1467_v14 = vadd.f32 %v3699_v47, %v1466_v3 }
 0x2a6   :  { %3165 = vtanh.bf16 %v1661_v28  ;;  %v1495_v26 = vpop.f32.mrf.mxu1  ;;  %2611 = vmatprep.subr.bf16.mxu1 %v3156_v57  ;;  %v1408_v59 = vadd.f32 %v4028_v6, %v3699_v47  ;;  %v1464_v2 = vadd.f32 %v3699_v47, %v4111_v33 }
 0x2a7   :  { %3167 = vtanh.bf16 %v1668_v35  ;;  %v4139_v20 = vadd.f32 %v3699_v47, %v1495_v26 }
 0x2a8   :  { %v2910_v63 = vpop.f32.mrf.mxu1  ;;  %3169 = vlog2.f32 %v2130_v51  ;;  %v1659_v38 = vpack.c.bf16 %v1411_v54, %v1408_v59  ;;  %v1666_v26 = vpack.c.bf16 %v1467_v14, %v1464_v2 }
 0x2a9   :  { %v4136_v7 = vadd.f32 %v2910_v63, %v3699_v47  ;;  %3171 = vlog2.f32 %v2131_v61  ;;  %v2090_v63 = vmax.f32 %v2082_v55, 0.0 }
 0x2aa   :  { %v1498_v36 = vpop.f32.mrf.mxu1  ;;  %3173 = vtanh.bf16 %v1660_v48 }
 0x2ab   :  { %v1671_v5 = vpack.c.bf16 %v4136_v7, %v4133_v53  ;;  %v4144_v40 = vadd.f32 %v3699_v47, %v1498_v36  ;;  %3175 = vtanh.bf16 %v1667_v12  ;;  %v2091_v36 = vmax.f32 %v2083_v52, 0.0 }
 0x2ac   :  { %v2913_v50 = vpop.f32.mrf.mxu1  ;;  %3177 = vtanh.bf16 %v1659_v38 }
 0x2ad   :  { %v1670_v28 = vpack.c.bf16 %v4144_v40, %v4139_v20  ;;  %2612 = vmatpush3.bf16.xpose.msra.mxu1 %v3162_v56  ;;  %v4156_v57 = vadd.f32 %v2913_v50, %v3699_v47  ;;  %v4186_v56 = vld [vmem:[%s4381_s4] ss:$0 sm:$0xff]  ;;  %3179 = vtanh.bf16 %v1666_v26 }
 0x2ae   :  { %v1511_v42 = vpop.f32.mrf.mxu1  ;;  %v1459_v45 = vadd.f32 %v4186_v56, %v4098_v25  ;;  %v1456_v24 = vadd.f32 %v4186_v56, %v4075_v21  ;;  %v1451_v26 = vadd.f32 %v4186_v56, %v4102_v44 }
 0x2af   :  { %v4162_v32 = vadd.f32 %v3699_v47, %v1511_v42 }
 0x2b0   :  { %v2914_v16 = vpop.f32.mrf.mxu1  ;;  %v1665_v59 = vpack.c.bf16 %v1459_v45, %v1456_v24 }
 0x2b1   :  { %v4159_v35 = vadd.f32 %v2914_v16, %v3699_v47 }
 0x2b2   :  { %v1514_v49 = vpop.f32.mrf.mxu1 }
 0x2b3   :  { %v3164_v15 = vpop.eup %3163  ;;  %v1673_v6 = vpack.c.bf16 %v4159_v35, %v4156_v57  ;;  %v4167_v3 = vadd.f32 %v3699_v47, %v1514_v49  ;;  %v1400_v47 = vadd.f32 %v4186_v56, %v4036_v43 }
 0x2b4   :  { %v3166_v33 = vpop.eup %3165  ;;  %v4169_v62 = vpop.f32.mrf.mxu1  ;;  %2615 = vmatprep.subr.bf16.mxu0 %v3164_v15  ;;  %2614 = vmatmul.mubr.bf16.vlgmr.msra.gmra.mxu1 %v3514_v8 }
 0x2b5   :  { %v3168_v51 = vpop.eup %3167  ;;  %v1672_v22 = vpack.c.bf16 %v4167_v3, %v4162_v32  ;;  %2616 = vmatpush3.bf16.xpose.msra.mxu0 %v3166_v33  ;;  %2649 = vmatprep.mubr.bf16.mxu1 %v3514_v8  ;;  %v1658_v54 = vpack.c.bf16 %v1403_v34, %v1400_v47 }
 0x2b6   :  { %v3170_v61 = vpop.eup %3169  ;;  %v4179_v48 = vpop.f32.mrf.mxu1  ;;  %2617 = vmatprep.subr.bf16.mxu0 %v3168_v51 }
 0x2b7   :  { %v3172_v12 = vpop.eup %3171  ;;  %v2139_v55 = vmul.f32 0.6931472, %v3170_v61  ;;  %3181 = vtanh.bf16 %v1658_v54  ;;  %v1448_v61 = vadd.f32 %v4186_v56, %v4082_v27 }
 0x2b8   :  { %v4192_v1 = vpop.f32.mrf.mxu1  ;;  %v2141_v50 = vmul.f32 0.6931472, %v3172_v12  ;;  %v3174_v2 = vpop.eup %3173  ;;  %3183 = vtanh.bf16 %v1665_v59 }
 0x2b9   :  { %v2154_v52 = vadd.f32 %v2139_v55, %v2090_v63  ;;  %v3176_v49 = vpop.eup %3175  ;;  %v1664_v12 = vpack.c.bf16 %v1451_v26, %v1448_v61  ;;  %3185 = vtanh.bf16 %v1657_v39 }
 0x2ba   :  { %v4196_v42 = vpop.f32.mrf.mxu1  ;;  %v2155_v14 = vadd.f32 %v2141_v50, %v2091_v36  ;;  %v3178_v45 = vpop.eup %3177 }
 0x2bb   :  { %v2162_v16 = vsub.f32 0.0, %v2154_v52  ;;  %v3180_v47 = vpop.eup %3179  ;;  %3187 = vtanh.bf16 %v1664_v12 }
 0x2bc   :  { %v4198_v25 = vpop.f32.mrf.mxu1  ;;  %v2163_v38 = vsub.f32 0.0, %v2155_v14  ;;  %3189 = vtanh.bf16 %v1656_v30 }
 0x2bd   :  { %2618 = vmatpush3.bf16.xpose.msra.mxu0 %v3174_v2  ;;  %v2170_v43 = vmax.f32 %v2162_v16, -100.0  ;;  %3191 = vtanh.bf16 %v1663_v0  ;;  %v1552_v9 = vadd.f32 %v4186_v56, %v4198_v25 }
 0x2be   :  { %v4200_v15 = vpop.f32.mrf.mxu1  ;;  %2619 = vmatprep.subr.bf16.mxu0 %v3176_v49  ;;  %v2171_v21 = vmax.f32 %v2163_v38, -100.0  ;;  %3193 = vtanh.bf16 %v1655_v41 }
 0x2bf   :  { %v2267_v33 = vsel %vm2266_vm0, %v2170_v43, 0.0  ;;  %3195 = vtanh.bf16 %v1662_v23 }
 0x2c0   :  { %v2922_v51 = vpop.f32.mrf.mxu1  ;;  %v2268_v63 = vsel %vm2266_vm0, %v2171_v21, 0.0  ;;  %3197 = vtanh.bf16 %v1654_v37 }
 0x2c1   :  { %v4208_v34 = vadd.f32 %v2268_v63, %v2267_v33  ;;  %v1555_v0 = vadd.f32 %v4186_v56, %v2922_v51 }
 0x2c2   :  { %v4210_v36 = vpop.f32.mrf.mxu1 }
 0x2c4   :  { %v2925_v55 = vpop.f32.mrf.mxu1 }
 0x2c5   :  { %2620 = vmatpush3.bf16.xpose.msra.mxu0 %v3178_v45  ;;  %v4216_v24 = vadd.f32 %v4186_v56, %v2925_v55  ;;  %v3182_v4 = vpop.eup %3181  ;;  %v1677_v45 = vpack.c.bf16 %v1555_v0, %v1552_v9 }
 0x2c6   :  { %v1559_v44 = vpop.f32.mrf.mxu1  ;;  %2621 = vmatprep.subr.bf16.mxu0 %v3180_v47  ;;  %v3184_v59 = vpop.eup %3183 }
 0x2c7   :  { %v4222_v54 = vadd.f32 %v4186_v56, %v1559_v44  ;;  %v3186_v43 = vpop.eup %3185  ;;  %3199 = vtanh.bf16 %v1677_v45 }
 0x2c8   :  { %v2926_v50 = vpop.f32.mrf.mxu1 }
 0x2c9   :  { %v4219_v27 = vadd.f32 %v4186_v56, %v2926_v50  ;;  %v3188_v26 = vpop.eup %3187 }
 0x2ca   :  { %v1562_v52 = vpop.f32.mrf.mxu1  ;;  %v3190_v63 = vpop.eup %3189 }
 0x2cb   :  { %v1679_v14 = vpack.c.bf16 %v4219_v27, %v4216_v24  ;;  %v4227_v18 = vadd.f32 %v4186_v56, %v1562_v52  ;;  %v3192_v61 = vpop.eup %3191 }
 0x2cc   :  { %v4229_v39 = vpop.f32.mrf.mxu1 }
 0x2cd   :  { %v1678_v16 = vpack.c.bf16 %v4227_v18, %v4222_v54  ;;  %2622 = vmatpush3.bf16.xpose.msra.mxu0 %v3182_v4 }
 0x2ce   :  { %v4236_v2 = vpop.f32.mrf.mxu1  ;;  %2623 = vmatprep.subr.bf16.mxu0 %v3184_v59 }
 0x2d0   :  { %v4241_v38 = vpop.f32.mrf.mxu1 }
 0x2d2   :  { %v4243_v49 = vpop.f32.mrf.mxu1 }
 0x2d4   :  { %v2933_v21 = vpop.f32.mrf.mxu1 }
 0x2d5   :  { %2624 = vmatpush3.bf16.xpose.msra.mxu0 %v3186_v43 }
 0x2d6   :  { %v4248_v13 = vpop.f32.mrf.mxu1  ;;  %2625 = vmatprep.subr.bf16.mxu0 %v3188_v26  ;;  %v3194_v26 = vpop.eup %3193 }
 0x2d8   :  { %v2934_v46 = vpop.f32.mrf.mxu1 }
 0x2d9   :  { %v1870_v30 = vpop.f32.mrf.mxu0  ;;  %v1603_v9 = vadd.f32 %v4186_v56, %v2934_v46 }
 0x2da   :  { %v4253_v19 = vpop.f32.mrf.mxu1  ;;  %v4256_v31 = vadd.f32 %v1870_v30, %v4087_v10 }
 0x2db   :  { %v1872_v33 = vpop.f32.mrf.mxu0 }
 0x2dc   :  { %v2937_v29 = vpop.f32.mrf.mxu1  ;;  %v2086_v60 = vsub.f32 0.0, %v4256_v31  ;;  %v4261_v41 = vadd.f32 %v1872_v33, %v4087_v10  ;;  %v3196_v33 = vpop.eup %3195 }
 0x2dd   :  { %2626 = vmatpush3.bf16.xpose.msra.mxu0 %v3190_v63  ;;  %v1874_v17 = vpop.f32.mrf.mxu0  ;;  %v1616_v50 = vadd.f32 %v4186_v56, %v2937_v29  ;;  %v1547_v63 = vadd.f32 %v4186_v56, %v4210_v36  ;;  %v1600_v36 = vadd.f32 %v4186_v56, %v2933_v21 }
 0x2de   :  { %v1607_v23 = vpop.f32.mrf.mxu1  ;;  %2627 = vmatprep.subr.bf16.mxu0 %v3192_v61  ;;  %v2102_v51 = vand.u32 2147483647, %v2086_v60  ;;  %v2087_v12 = vsub.f32 0.0, %v4261_v41 }
 0x2df   :  { %v1875_v55 = vpop.f32.mrf.mxu0  ;;  %v1608_v4 = vadd.f32 %v4186_v56, %v1607_v23  ;;  %v1544_v23 = vadd.f32 %v4186_v56, %v4200_v15 }
 0x2e0   :  { %v2938_v47 = vpop.f32.mrf.mxu1  ;;  %v2110_v44 = vsub.f32 0.0, %v2102_v51  ;;  %v2103_v25 = vand.u32 2147483647, %v2087_v12 }
 0x2e1   :  { %v1619_v52 = vadd.f32 %v4186_v56, %v2938_v47  ;;  %v1676_v47 = vpack.c.bf16 %v1547_v63, %v1544_v23  ;;  %v1528_v23 = vadd.f32 %v4186_v56, %v4179_v48 }
 0x2e2   :  { %v1610_v11 = vpop.f32.mrf.mxu1  ;;  %v2122_v58 = vmul.f32 1.442695, %v2110_v44  ;;  %v2111_v37 = vsub.f32 0.0, %v2103_v25  ;;  %v1683_v25 = vpack.c.bf16 %v1603_v9, %v1600_v36  ;;  %v1584_v36 = vadd.f32 %v4186_v56, %v4229_v39 }
 0x2e3   :  { %v1685_v59 = vpack.c.bf16 %v1619_v52, %v1616_v50  ;;  %v1611_v43 = vadd.f32 %v4186_v56, %v1610_v11  ;;  %v3198_v11 = vpop.eup %3197  ;;  %v1576_v39 = vadd.f32 %v4186_v56, %v4236_v2 }
 0x2e4   :  { %v1829_v30 = vpop.f32.mrf.mxu1  ;;  %3201 = vpow2.f32 %v2122_v58  ;;  %v2124_v0 = vmul.f32 1.442695, %v2111_v37  ;;  %v1539_v58 = vadd.f32 %v4186_v56, %v4192_v1 }
 0x2e5   :  { %3203 = vtanh.bf16 %v1685_v59  ;;  %2628 = vmatpush3.bf16.xpose.msra.mxu0 %v3194_v26  ;;  %v1684_v29 = vpack.c.bf16 %v1611_v43, %v1608_v4  ;;  %v4280_v61 = vadd.f32 %v1829_v30, %v4087_v10  ;;  %v1595_v4 = vadd.f32 %v4186_v56, %v4253_v19  ;;  %v3200_v30 = vpop.eup %3199 }
 0x2e6   :  { %2629 = vmatprep.subr.bf16.mxu0 %v3196_v33  ;;  %v1831_v17 = vpop.f32.mrf.mxu1  ;;  %3205 = vpow2.f32 %v2124_v0  ;;  %v1536_v59 = vadd.f32 %v4186_v56, %v4169_v62  ;;  %v1592_v26 = vadd.f32 %v4186_v56, %v4248_v13  ;;  %v1531_v62 = vadd.f32 %v4186_v56, %v4196_v42 }
 0x2e7   :  { %3207 = vtanh.bf16 %v1684_v29  ;;  %v2084_v51 = vsub.f32 0.0, %v4280_v61  ;;  %v4287_v45 = vadd.f32 %v1831_v17, %v4087_v10  ;;  %v1587_v13 = vadd.f32 %v4186_v56, %v4241_v38 }
 0x2e8   :  { %v1833_v55 = vpop.f32.mrf.mxu1  ;;  %3209 = vtanh.bf16 %v1676_v47  ;;  %v1675_v33 = vpack.c.bf16 %v1539_v58, %v1536_v59  ;;  %v1682_v1 = vpack.c.bf16 %v1595_v4, %v1592_v26  ;;  %v1579_v38 = vadd.f32 %v4186_v56, %v4243_v49 }
 0x2e9   :  { %v2100_v44 = vand.u32 2147483647, %v2084_v51  ;;  %v2085_v46 = vsub.f32 0.0, %v4287_v45  ;;  %3211 = vtanh.bf16 %v1683_v25  ;;  %v1674_v55 = vpack.c.bf16 %v1531_v62, %v1528_v23 }
 0x2ea   :  { %v1834_v50 = vpop.f32.mrf.mxu1  ;;  %v1681_v47 = vpack.c.bf16 %v1587_v13, %v1584_v36  ;;  %v2094_v49 = vmax.f32 %v2086_v60, 0.0  ;;  %v2095_v56 = vmax.f32 %v2087_v12, 0.0 }
 0x2eb   :  { %v2108_v52 = vsub.f32 0.0, %v2100_v44  ;;  %v2101_v15 = vand.u32 2147483647, %v2085_v46  ;;  %v2093_v35 = vmax.f32 %v2085_v46, 0.0 }
 0x2ed   :  { %2630 = vmatpush3.bf16.xpose.msra.mxu0 %v3198_v11  ;;  %v2118_v21 = vmul.f32 1.442695, %v2108_v52  ;;  %v2109_v37 = vsub.f32 0.0, %v2101_v15  ;;  %v1680_v11 = vpack.c.bf16 %v1579_v38, %v1576_v39 }
 0x2ef   :  { %3213 = vpow2.f32 %v2118_v21  ;;  %v2120_v43 = vmul.f32 1.442695, %v2109_v37 }
 0x2f1   :  { %v3202_v0 = vpop.eup %3201  ;;  %3215 = vpow2.f32 %v2120_v43  ;;  %v2092_v43 = vmax.f32 %v2084_v51, 0.0 }
 0x2f2   :  { %v2134_v9 = vadd.f32 1.0, %v3202_v0  ;;  %3217 = vtanh.bf16 %v1675_v33 }
 0x2f3   :  { %v3204_v63 = vpop.eup %3203  ;;  %3219 = vtanh.bf16 %v1682_v1 }
 0x2f4   :  { %v3206_v29 = vpop.eup %3205  ;;  %2633 = vmatprep.subr.bf16.mxu1 %v3204_v63  ;;  %2632 = vmatmul.mubr.bf16.vlgmr.msra.gmra.mxu0 %v3514_v8  ;;  %3221 = vlog2.f32 %v2134_v9 }
 0x2f5   :  { %v3208_v19 = vpop.eup %3207  ;;  %2634 = vmatpush3.bf16.xpose.msra.mxu1 %v3200_v30  ;;  %v2135_v17 = vadd.f32 1.0, %v3206_v29 }
 0x2f6   :  { %2635 = vmatprep.subr.bf16.mxu1 %v3208_v19  ;;  %v3210_v44 = vpop.eup %3209 }
 0x2f7   :  { %3223 = vlog2.f32 %v2135_v17  ;;  %v3212_v25 = vpop.eup %3211 }
 0x2f8   :  { %3225 = vtanh.bf16 %v1674_v55 }
 0x2f9   :  { %3227 = vtanh.bf16 %v1681_v47 }
 0x2fc   :  { %v3214_v42 = vpop.eup %3213 }
 0x2fd   :  { %2636 = vmatpush3.bf16.xpose.msra.mxu1 %v3210_v44  ;;  %v2132_v50 = vadd.f32 1.0, %v3214_v42 }
 0x2fe   :  { %v3216_v52 = vpop.eup %3215  ;;  %2637 = vmatprep.subr.bf16.mxu1 %v3212_v25 }
 0x2ff   :  { %3229 = vlog2.f32 %v2132_v50  ;;  %v2133_v48 = vadd.f32 1.0, %v3216_v52 }
 0x300   :  { %v3218_v15 = vpop.eup %3217 }
 0x301   :  { %3231 = vlog2.f32 %v2133_v48  ;;  %v3220_v58 = vpop.eup %3219 }
 0x302   :  { %v3222_v21 = vpop.eup %3221  ;;  %3233 = vtanh.bf16 %v1673_v6 }
 0x303   :  { %3235 = vtanh.bf16 %v1680_v11  ;;  %v2147_v4 = vmul.f32 0.6931472, %v3222_v21 }
 0x304   :  { %v3224_v37 = vpop.eup %3223  ;;  %3237 = vtanh.bf16 %v1672_v22 }
 0x305   :  { %2638 = vmatpush3.bf16.xpose.msra.mxu1 %v3218_v15  ;;  %v2149_v2 = vmul.f32 0.6931472, %v3224_v37  ;;  %v2158_v26 = vadd.f32 %v2147_v4, %v2094_v49  ;;  %3239 = vtanh.bf16 %v1679_v14 }
 0x306   :  { %2639 = vmatprep.subr.bf16.mxu1 %v3220_v58  ;;  %v3226_v59 = vpop.eup %3225  ;;  %3241 = vtanh.bf16 %v1671_v5 }
 0x307   :  { %v3228_v30 = vpop.eup %3227  ;;  %v2159_v6 = vadd.f32 %v2149_v2, %v2095_v56  ;;  %v2166_v12 = vsub.f32 0.0, %v2158_v26  ;;  %3243 = vtanh.bf16 %v1678_v16 }
 0x308   :  { %3245 = vtanh.bf16 %v1670_v28 }
 0x309   :  { %v2167_v33 = vsub.f32 0.0, %v2159_v6  ;;  %v2174_v46 = vmax.f32 %v2166_v12, -100.0 }
 0x30b   :  { %v2175_v22 = vmax.f32 %v2167_v33, -100.0  ;;  %v2274_v14 = vsel %vm2266_vm0, %v2174_v46, 0.0 }
 0x30c   :  { %v3230_v0 = vpop.eup %3229 }
 0x30d   :  { %2640 = vmatpush3.bf16.xpose.msra.mxu1 %v3226_v59  ;;  %v2143_v57 = vmul.f32 0.6931472, %v3230_v0  ;;  %v2276_v19 = vsel %vm2266_vm0, %v2175_v22, 0.0 }
 0x30e   :  { %v3232_v31 = vpop.eup %3231  ;;  %2641 = vmatprep.subr.bf16.mxu1 %v3228_v30 }
 0x30f   :  { %v2156_v60 = vadd.f32 %v2143_v57, %v2092_v43  ;;  %v2145_v41 = vmul.f32 0.6931472, %v3232_v31 }
 0x310   :  { %v3234_v63 = vpop.eup %3233 }
 0x311   :  { %v2164_v61 = vsub.f32 0.0, %v2156_v60  ;;  %v2157_v51 = vadd.f32 %v2145_v41, %v2093_v35  ;;  %v3236_v29 = vpop.eup %3235 }
 0x312   :  { %v3238_v17 = vpop.eup %3237 }
 0x313   :  { %v2172_v1 = vmax.f32 %v2164_v61, -100.0  ;;  %v2165_v45 = vsub.f32 0.0, %v2157_v51  ;;  %v3240_v53 = vpop.eup %3239 }
 0x314   :  { %v3242_v7 = vpop.eup %3241 }
 0x315   :  { %2642 = vmatpush3.bf16.xpose.msra.mxu1 %v3234_v63  ;;  %v2270_v32 = vsel %vm2266_vm0, %v2172_v1, 0.0  ;;  %v2173_v3 = vmax.f32 %v2165_v45, -100.0 }
 0x316   :  { %2643 = vmatprep.subr.bf16.mxu1 %v3236_v29  ;;  %v2271_v24 = vadd.f32 %v2270_v32, %v4208_v34  ;;  %v3244_v34 = vpop.eup %3243 }
 0x317   :  { %v2272_v27 = vsel %vm2266_vm0, %v2173_v3, 0.0  ;;  %v3246_v20 = vpop.eup %3245 }
 0x318   :  { %v2273_v9 = vadd.f32 %v2272_v27, %v2271_v24 }
 0x31a   :  { %v2275_v62 = vadd.f32 %v2274_v14, %v2273_v9 }
 0x31c   :  { %v4344_v13 = vadd.f32 %v2276_v19, %v2275_v62 }
 0x31d   :  { %2644 = vmatpush3.bf16.xpose.msra.mxu1 %v3238_v17 }
 0x31e   :  { %2645 = vmatprep.subr.bf16.mxu1 %v3240_v53 }
 0x324   :  { %v1911_v5 = vpop.f32.mrf.mxu1 }
 0x325   :  { %2646 = vmatpush3.bf16.xpose.msra.mxu1 %v3242_v7  ;;  %v1912_v54 = vadd.f32 %v1911_v5, %v4087_v10 }
 0x326   :  { %2647 = vmatprep.subr.bf16.mxu1 %v3244_v34  ;;  %v1913_v18 = vpop.f32.mrf.mxu1 }
 0x327   :  { %v2088_v16 = vsub.f32 0.0, %v1912_v54  ;;  %v1914_v23 = vadd.f32 %v1913_v18, %v4087_v10 }
 0x328   :  { %v1915_v36 = vpop.f32.mrf.mxu1 }
 0x329   :  { %v2104_v55 = vand.u32 2147483647, %v2088_v16  ;;  %v2089_v47 = vsub.f32 0.0, %v1914_v23  ;;  %v2096_v30 = vmax.f32 %v2088_v16, 0.0 }
 0x32a   :  { %v1916_v44 = vpop.f32.mrf.mxu1 }
 0x32b   :  { %v2112_v25 = vsub.f32 0.0, %v2104_v55  ;;  %v2105_v42 = vand.u32 2147483647, %v2089_v47  ;;  %v2097_v31 = vmax.f32 %v2089_v47, 0.0 }
 0x32d   :  { %2648 = vmatpush3.bf16.xpose.msra.mxu1 %v3246_v20  ;;  %v2126_v40 = vmul.f32 1.442695, %v2112_v25  ;;  %v2113_v28 = vsub.f32 0.0, %v2105_v42 }
 0x32f   :  { %3247 = vpow2.f32 %v2126_v40  ;;  %v2128_v50 = vmul.f32 1.442695, %v2113_v28 }
 0x331   :  { %3249 = vpow2.f32 %v2128_v50 }
 0x334   :  { %2650 = vmatmul.mubr.bf16.vlgmr.msra.gmra.mxu1 %v3514_v8  ;;  %v1952_v52 = vpop.f32.mrf.mxu0 }
 0x335   :  { %v1953_v38 = vadd.f32 %v1952_v52, %v4087_v10 }
 0x336   :  { %v1954_v48 = vpop.f32.mrf.mxu0 }
 0x337   :  { %v2186_v39 = vand.u32 2147483647, %v1953_v38  ;;  %v1955_v15 = vadd.f32 %v1954_v48, %v4087_v10  ;;  %v2178_v22 = vmax.f32 %v1953_v38, 0.0 }
 0x338   :  { %v1956_v11 = vpop.f32.mrf.mxu0 }
 0x339   :  { %v2194_v58 = vsub.f32 0.0, %v2186_v39  ;;  %v2187_v21 = vand.u32 2147483647, %v1955_v15  ;;  %v2179_v14 = vmax.f32 %v1955_v15, 0.0 }
 0x33a   :  { %v1957_v37 = vpop.f32.mrf.mxu0 }
 0x33b   :  { %v2202_v49 = vmul.f32 1.442695, %v2194_v58  ;;  %v2195_v4 = vsub.f32 0.0, %v2187_v21 }
 0x33c   :  { %v3248_v56 = vpop.eup %3247 }
 0x33d   :  { %v2136_v2 = vadd.f32 1.0, %v3248_v56  ;;  %3251 = vpow2.f32 %v2202_v49  ;;  %v2204_v59 = vmul.f32 1.442695, %v2195_v4 }
 0x33e   :  { %v3250_v43 = vpop.eup %3249 }
 0x33f   :  { %3253 = vlog2.f32 %v2136_v2  ;;  %v2137_v8 = vadd.f32 1.0, %v3250_v43 }
 0x340   :  { %3255 = vpow2.f32 %v2204_v59 }
 0x341   :  { %3257 = vlog2.f32 %v2137_v8 }
 0x34a   :  { %v3252_v26 = vpop.eup %3251 }
 0x34b   :  { %v2218_v0 = vadd.f32 1.0, %v3252_v26 }
 0x34c   :  { %v3254_v57 = vpop.eup %3253 }
 0x34d   :  { %v3256_v35 = vpop.eup %3255  ;;  %v2151_v6 = vmul.f32 0.6931472, %v3254_v57  ;;  %3259 = vlog2.f32 %v2218_v0 }
 0x34e   :  { %v3258_v60 = vpop.eup %3257  ;;  %v2219_v41 = vadd.f32 1.0, %v3256_v35 }
 0x34f   :  { %v2160_v12 = vadd.f32 %v2151_v6, %v2096_v30  ;;  %v2153_v61 = vmul.f32 0.6931472, %v3258_v60 }
 0x350   :  { %3261 = vlog2.f32 %v2219_v41 }
 0x351   :  { %v2161_v51 = vadd.f32 %v2153_v61, %v2097_v31  ;;  %v2168_v33 = vsub.f32 0.0, %v2160_v12 }
 0x353   :  { %v2169_v1 = vsub.f32 0.0, %v2161_v51  ;;  %v2176_v45 = vmax.f32 %v2168_v33, -100.0 }
 0x355   :  { %v2177_v46 = vmax.f32 %v2169_v1, -100.0  ;;  %v2278_v63 = vsel %vm2266_vm0, %v2176_v45, 0.0 }
 0x356   :  { %v2279_v29 = vadd.f32 %v2278_v63, %v4344_v13 }
 0x357   :  { %v2280_v32 = vsel %vm2266_vm0, %v2177_v46, 0.0 }
 0x358   :  { %v2281_v3 = vadd.f32 %v2280_v32, %v2279_v29 }
 0x35a   :  { %v3260_v24 = vpop.eup %3259  ;;  %2282 = vadd.xlane.f32.xlu0 %v2281_v3 }
 0x35b   :  { %v2227_v27 = vmul.f32 0.6931472, %v3260_v24 }
 0x35d   :  { %v3262_v9 = vpop.eup %3261  ;;  %v2242_v19 = vadd.f32 %v2227_v27, %v2178_v22 }
 0x35e   :  { %v2229_v62 = vmul.f32 0.6931472, %v3262_v9 }
 0x35f   :  { %v2250_v17 = vsub.f32 0.0, %v2242_v19 }
 0x360   :  { %v2243_v53 = vadd.f32 %v2229_v62, %v2179_v14 }
 0x361   :  { %v2258_v7 = vmax.f32 %v2250_v17, -100.0 }
 0x362   :  { %v2251_v5 = vsub.f32 0.0, %v2243_v53 }
 0x363   :  { %v2291_v34 = vsel %vm2266_vm0, %v2258_v7, 0.0 }
 0x364   :  { %v2259_v54 = vmax.f32 %v2251_v5, -100.0 }
 0x366   :  { %v2292_v13 = vsel %vm2266_vm0, %v2259_v54, 0.0 }
 0x367   :  { %v2293_v18 = vadd.f32 %v2292_v13, %v2291_v34 }
 0x374   :  { %v1993_v16 = vpop.f32.mrf.mxu1 }
 0x375   :  { %v1994_v23 = vadd.f32 %v1993_v16, %v4087_v10 }
 0x376   :  { %v1995_v36 = vpop.f32.mrf.mxu1 }
 0x377   :  { %v2188_v55 = vand.u32 2147483647, %v1994_v23  ;;  %v1996_v47 = vadd.f32 %v1995_v36, %v4087_v10  ;;  %v2180_v15 = vmax.f32 %v1994_v23, 0.0 }
 0x378   :  { %v1997_v44 = vpop.f32.mrf.mxu1 }
 0x379   :  { %v2196_v25 = vsub.f32 0.0, %v2188_v55  ;;  %v2189_v42 = vand.u32 2147483647, %v1996_v47  ;;  %v2181_v21 = vmax.f32 %v1996_v47, 0.0 }
 0x37a   :  { %v1998_v20 = vpop.f32.mrf.mxu1 }
 0x37b   :  { %v2206_v40 = vmul.f32 1.442695, %v2196_v25  ;;  %v2197_v28 = vsub.f32 0.0, %v2189_v42 }
 0x37d   :  { %3263 = vpow2.f32 %v2206_v40  ;;  %v2208_v50 = vmul.f32 1.442695, %v2197_v28 }
 0x37f   :  { %3265 = vpow2.f32 %v2208_v50 }
 0x38a   :  { %v3264_v52 = vpop.eup %3263 }
 0x38b   :  { %v2220_v38 = vadd.f32 1.0, %v3264_v52 }
 0x38c   :  { %v3266_v48 = vpop.eup %3265 }
 0x38d   :  { %3267 = vlog2.f32 %v2220_v38  ;;  %v2221_v39 = vadd.f32 1.0, %v3266_v48 }
 0x38f   :  { %3269 = vlog2.f32 %v2221_v39 }
 0x39a   :  { %v3268_v11 = vpop.eup %3267 }
 0x39b   :  { %v2231_v58 = vmul.f32 0.6931472, %v3268_v11 }
 0x39c   :  { %v3270_v37 = vpop.eup %3269 }
 0x39d   :  { %v2244_v49 = vadd.f32 %v2231_v58, %v2180_v15  ;;  %v2233_v4 = vmul.f32 0.6931472, %v3270_v37 }
 0x39f   :  { %v2252_v56 = vsub.f32 0.0, %v2244_v49  ;;  %v2245_v2 = vadd.f32 %v2233_v4, %v2181_v21 }
 0x3a1   :  { %v2260_v59 = vmax.f32 %v2252_v56, -100.0  ;;  %v2253_v43 = vsub.f32 0.0, %v2245_v2 }
 0x3a3   :  { %v2294_v8 = vsel %vm2266_vm0, %v2260_v59, 0.0  ;;  %v2261_v26 = vmax.f32 %v2253_v43, -100.0 }
 0x3a4   :  { %v2295_v30 = vadd.f32 %v2294_v8, %v2293_v18 }
 0x3a5   :  { %v2296_v0 = vsel %vm2266_vm0, %v2261_v26, 0.0 }
 0x3a6   :  { %v4363_v57 = vadd.f32 %v2296_v0, %v2295_v30 }
 0x3b4   :  { %v2034_v35 = vpop.f32.mrf.mxu0 }
 0x3b5   :  { %v2035_v41 = vadd.f32 %v2034_v35, %v4087_v10 }
 0x3b6   :  { %v2036_v6 = vpop.f32.mrf.mxu0 }
 0x3b7   :  { %v2037_v12 = vadd.f32 %v2036_v6, %v4087_v10  ;;  %v2190_v61 = vand.u32 2147483647, %v2035_v41  ;;  %v2182_v42 = vmax.f32 %v2035_v41, 0.0 }
 0x3b8   :  { %v2038_v31 = vpop.f32.mrf.mxu0 }
 0x3b9   :  { %v2191_v51 = vand.u32 2147483647, %v2037_v12  ;;  %v2198_v33 = vsub.f32 0.0, %v2190_v61  ;;  %v2183_v52 = vmax.f32 %v2037_v12, 0.0 }
 0x3ba   :  { %v2039_v60 = vpop.f32.mrf.mxu0 }
 0x3bb   :  { %v2199_v1 = vsub.f32 0.0, %v2191_v51  ;;  %v2210_v45 = vmul.f32 1.442695, %v2198_v33 }
 0x3bd   :  { %v2212_v29 = vmul.f32 1.442695, %v2199_v1  ;;  %3271 = vpow2.f32 %v2210_v45 }
 0x3bf   :  { %3273 = vpow2.f32 %v2212_v29 }
 0x3ca   :  { %v3272_v14 = vpop.eup %3271 }
 0x3cb   :  { %v2222_v53 = vadd.f32 1.0, %v3272_v14 }
 0x3cc   :  { %v3274_v17 = vpop.eup %3273 }
 0x3cd   :  { %v2223_v18 = vadd.f32 1.0, %v3274_v17  ;;  %3275 = vlog2.f32 %v2222_v53 }
 0x3da   :  { %v3276_v47 = vpop.eup %3275 }
 0x3db   :  { %v2235_v20 = vmul.f32 0.6931472, %v3276_v47 }
 0x3dd   :  { %v2246_v50 = vadd.f32 %v2235_v20, %v2182_v42 }
 0x3df   :  { %v2254_v48 = vsub.f32 0.0, %v2246_v50 }
 0x3e1   :  { %v2262_v15 = vmax.f32 %v2254_v48, -100.0 }
 0x3e3   :  { %v2283_v46 = vpop.xlane.xlu0 %2282  ;;  %v2298_v21 = vsel %vm2266_vm0, %v2262_v15, 0.0 }
 0x3e4   :  { %v2284_v63 = vrot.slane %v2283_v46, 4  ;;  %v2299_v8 = vadd.f32 %v2298_v21, %v4363_v57 }
 0x3e6   :  { %v2285_v32 = vadd.f32 %v2284_v63, %v2283_v46 }
 0x3e8   :  { %v2286_v3 = vrot.slane %v2285_v32, 2 }
 0x3ea   :  { %v2287_v22 = vadd.f32 %v2286_v3, %v2285_v32  ;;  %v2315_v32 = vlaneseq }
 0x3ec   :  { %v2288_v24 = vrot.slane %v2287_v22, 1  ;;  %v2316_v3 = vshrl.u32 %v2315_v32, 7 }
 0x3ee   :  { %v2289_v27 = vadd.f32 %v2288_v24, %v2287_v22  ;;  %v2318_v22 = vand.u32 127, %v2315_v32  ;;  %vm2319_vm1 = vcmp.eq.s32.totalorder %v2316_v3, 0 }
 0x3f0   :  { %2939 = vpush %v2289_v27  ;;  %vm2322_vm2 = vcmp.eq.s32.totalorder %v2318_v22, 1  ;;  %vm2320_vm3 = vcmp.eq.s32.totalorder %v2318_v22, 0 }
 0x3f1   :  { %vm2323_vm4 = vmand %vm2319_vm1, %vm2322_vm2 }
 0x3f2   :  { %vm2321_vm5 = vmand %vm2319_vm1, %vm2320_vm3 }
 0x3f4   :  { %v2075_v9 = vpop.f32.mrf.mxu1 }
 0x3f5   :  { %v2076_v19 = vadd.f32 %v2075_v9, %v4087_v10 }
 0x3f6   :  { %v2077_v62 = vpop.f32.mrf.mxu1 }
 0x3f7   :  { %v2192_v7 = vand.u32 2147483647, %v2076_v19  ;;  %v2078_v5 = vadd.f32 %v2077_v62, %v4087_v10  ;;  %v2184_v49 = vmax.f32 %v2076_v19, 0.0 }
 0x3f8   :  { %v2079_v34 = vpop.f32.mrf.mxu1 }
 0x3f9   :  { %v2200_v54 = vsub.f32 0.0, %v2192_v7  ;;  %v2193_v13 = vand.u32 2147483647, %v2078_v5  ;;  %v2185_v59 = vmax.f32 %v2078_v5, 0.0 }
 0x3fa   :  { %v2080_v16 = vpop.f32.mrf.mxu1 }
 0x3fb   :  { %v2214_v23 = vmul.f32 1.442695, %v2200_v54  ;;  %v2201_v36 = vsub.f32 0.0, %v2193_v13 }
 0x3fd   :  { %3277 = vpow2.f32 %v2214_v23  ;;  %v2216_v55 = vmul.f32 1.442695, %v2201_v36 }
 0x3fe   :  { %3279 = vlog2.f32 %v2223_v18 }
 0x3ff   :  { %3281 = vpow2.f32 %v2216_v55 }
 0x40a   :  { %v3278_v44 = vpop.eup %3277 }
 0x40b   :  { %v3280_v25 = vpop.eup %3279  ;;  %v2224_v40 = vadd.f32 1.0, %v3278_v44 }
 0x40c   :  { %v3282_v28 = vpop.eup %3281  ;;  %v2237_v38 = vmul.f32 0.6931472, %v3280_v25 }
 0x40d   :  { %3283 = vlog2.f32 %v2224_v40  ;;  %v2225_v10 = vadd.f32 1.0, %v3282_v28 }
 0x40e   :  { %v2247_v39 = vadd.f32 %v2237_v38, %v2183_v52 }
 0x40f   :  { %3285 = vlog2.f32 %v2225_v10 }
 0x410   :  { %v2255_v11 = vsub.f32 0.0, %v2247_v39 }
 0x412   :  { %v2263_v37 = vmax.f32 %v2255_v11, -100.0 }
 0x414   :  { %v2300_v0 = vsel %vm2266_vm0, %v2263_v37, 0.0 }
 0x415   :  { %v2301_v31 = vadd.f32 %v2300_v0, %v2299_v8 }
 0x41a   :  { %v3284_v58 = vpop.eup %3283 }
 0x41b   :  { %v2239_v4 = vmul.f32 0.6931472, %v3284_v58 }
 0x41c   :  { %v3286_v56 = vpop.eup %3285 }
 0x41d   :  { %v2248_v2 = vadd.f32 %v2239_v4, %v2184_v49  ;;  %v2241_v43 = vmul.f32 0.6931472, %v3286_v56 }
 0x41f   :  { %v2256_v26 = vsub.f32 0.0, %v2248_v2  ;;  %v2249_v30 = vadd.f32 %v2241_v43, %v2185_v59 }
 0x421   :  { %v2264_v35 = vmax.f32 %v2256_v26, -100.0  ;;  %v2257_v6 = vsub.f32 0.0, %v2249_v30  ;;  %s2940_s4 = spop %2939 }
 0x422   :  { %v2326_v27 = vstv %s2940_s4 }
 0x423   :  { %v2265_v60 = vmax.f32 %v2257_v6, -100.0  ;;  %v2302_v41 = vsel %vm2266_vm0, %v2264_v35, 0.0 }
 0x424   :  { %v2303_v12 = vadd.f32 %v2302_v41, %v2301_v31 }
 0x425   :  { %v2304_v61 = vsel %vm2266_vm0, %v2265_v60, 0.0 }
 0x426   :  { %v2305_v51 = vadd.f32 %v2304_v61, %v2303_v12 }
 0x428   :  { %2306 = vadd.xlane.f32.xlu0 %v2305_v51 }
 0x4b1   :  { %v2307_v33 = vpop.xlane.xlu0 %2306 }
 0x4b2   :  { %v2308_v1 = vrot.slane %v2307_v33, 4 }
 0x4b4   :  { %v2309_v45 = vadd.f32 %v2308_v1, %v2307_v33 }
 0x4b6   :  { %v2310_v46 = vrot.slane %v2309_v45, 2 }
 0x4b8   :  { %v2311_v57 = vadd.f32 %v2310_v46, %v2309_v45 }
 0x4ba   :  { %v2312_v63 = vrot.slane %v2311_v57, 1 }
 0x4bc   :  { %v2313_v29 = vadd.f32 %v2312_v63, %v2311_v57 }
 0x4be   :  { %2941 = vpush %v2313_v29 }
 0x4ef   :  { %s2942_s28 = spop %2941 }
 0x4f0   :  { %v2324_v24 = vstv %s2942_s28 }
 0x4f1   :  { %v2325_v14 = vsel %vm2323_vm4, %v2324_v24, 0.0 }
 0x4f2   :  { %v2327_v9 = vsel %vm2321_vm5, %v2326_v27, %v2325_v14 }
 0x4f3   :  { %2328 = vst [vmem:[#allocation9] sm:$0xff] %v2327_v9 }
 0x4f4   :  { %3360 = shalt.err (!%p3357_p5)
}
 0x4f5   :  { %2338 = dma.vmem_to_hbm [thread:$0]  %s2336_s27, 128, %s4384_s7, [#allocation5]  }
 0x4f6   :  { %3373 = dma.done.wait [#allocation5], 128  }
 0x4f7   :  { %3374 = vsyncadd [#allocation5], 4294967168 }
 0x4f8   :  { %2342 = vsyncpa [#allocation4], 1 }
 0x4f9   :  { %2343 = vsyncpa [#allocation7], 1 }
 0x4fa   :  { %2344 = vsyncpa [#allocation5], 1 }

</bundles_post_ra>
